<compile_context>
chip_gen: v7x
topology: tpu7x:2x2x1
jax: 0.10.0
libtpu: 0.0.40
codegen_flags: <defaults>
</compile_context>

<pallas_src>
import functools

import jax
import jax.numpy as jnp
from jax.experimental import pallas as pl
from jax.experimental.pallas import tpu as pltpu


def _round_up(n: int, m: int) -> int:
    return ((n + m - 1) // m) * m


def _sigmoid(z):
    # One EUP push per element (tanh) instead of two (exp then reciprocal).
    return 0.5 * jnp.tanh(0.5 * z) + 0.5


def _mlp_kernel(x_ref, w1_ref, w2_ref, w3_ref, o_ref, *, act_dtype):
    """Fused 3-layer MLP on a transposed (features, batch) tile.

    Shapes (tb = batch tile, h1p/h2p = padded hidden widths):
      x_ref : (8, tb)     rows 0..2 = x^T, row 3 = 1.0 (bias lane), rows 4..7 = 0
      w1_ref: (h1p, 8)    cols 0..2 = W1, col 3 = b1
      w2_ref: (h2p, h1p)  b2 folded into column h1 (as 2*b2, matched by 0.5 row)
      w3_ref: (8, h2p)    row 0 = w3 with 2*b3 folded into column h2
      o_ref : (1, tb)     lane-dense output slab
    """
    mxu_dtype = w2_ref.dtype
    x = x_ref[...].astype(w1_ref.dtype)                                   # (8, tb)

    # ---- layer 1 (+ bias) : single K=8 MXU matmul, f32 accumulation ----
    z1 = jnp.dot(w1_ref[...], x, preferred_element_type=jnp.float32)      # (h1p, tb)
    h1 = _sigmoid(z1.astype(act_dtype)).astype(mxu_dtype)

    # ---- layer 2 (+ bias folded into w2 via padded 0.5 activation rows) ----
    z2 = jnp.dot(w2_ref[...], h1, preferred_element_type=jnp.float32)     # (h2p, tb)
    h2 = _sigmoid(z2.astype(act_dtype)).astype(mxu_dtype)

    # ---- layer 3 (+ bias folded into w3) : (8, h2p) @ (h2p, tb) on the MXU ----
    z3 = jnp.dot(w3_ref[...], h2, preferred_element_type=jnp.float32)     # (8, tb)
    o_ref[...] = z3[0:1, :]                                               # row 0 only


def prepare_params(w1, b1, w2, b2, w3, b3, *, use_bf16=True):
    """One-time (model-load) packing of PyTorch nn.Linear params into padded,
    bias-folded, MXU-ready blocks.  Hoisted out of the per-call path so no
    HBM->HBM pad/cast traffic happens on every forward.

    PyTorch layout in:  w1 (h1,3) b1 (h1,)  w2 (h2,h1) b2 (h2,)  w3 (1,h2) b3 (1,).
    """
    h1, h2 = w1.shape[0], w2.shape[0]
    assert w1.shape == (h1, 3) and b1.shape == (h1,)
    assert w2.shape == (h2, h1) and b2.shape == (h2,)
    assert w3.shape == (1, h2) and b3.shape == (1,)

    # +1 guarantees at least one zero-padded (-> sigmoid(0)=0.5) row to carry
    # the folded bias of the next layer.
    h1p = _round_up(h1 + 1, 128)      # 600 -> 640
    h2p = _round_up(h2 + 1, 128)      # 200 -> 256

    f32 = jnp.float32
    wdt = jnp.bfloat16 if use_bf16 else f32

    # layer 1: (h1p, 8); cols 0..2 = W1, col 3 = b1 (matched by ones row of x).
    w1_k = jnp.zeros((h1p, 8), f32)
    w1_k = w1_k.at[:h1, 0:3].set(w1.astype(f32))
    w1_k = w1_k.at[:h1, 3].set(b1.astype(f32))

    # layer 2: (h2p, h1p); column h1 stores 2*b2 (padded h1 rows are exactly 0.5).
    # TODO(synk): store this column in f32 if bf16-rounded biases ever matter.
    w2_k = jnp.zeros((h2p, h1p), f32)
    w2_k = w2_k.at[:h2, :h1].set(w2.astype(f32))
    w2_k = w2_k.at[:h2, h1].set(2.0 * b2.astype(f32))

    # layer 3: (8, h2p); row 0 = w3, column h2 of row 0 stores 2*b3.
    w3_k = jnp.zeros((8, h2p), f32)
    w3_k = w3_k.at[0, :h2].set(w3.astype(f32).reshape(h2))
    w3_k = w3_k.at[0, h2].set(2.0 * b3.astype(f32).reshape(()))

    return w1_k.astype(wdt), w2_k.astype(wdt), w3_k.astype(wdt)


def _pick_tile_b(B: int) -> int:
    """>=2 lane-aligned batch tiles when possible (so the 'parallel' grid axis
    can use both v7x TensorCores), capped at 1024 (v5e scoped-VMEM safety)."""
    if B < 256 or B % 128 != 0:
        return B                      # single full-batch tile (always legal)
    cap = min(1024, B // 2)
    for t in range(cap - cap % 128, 0, -128):
        if B % t == 0:
            return t
    return B


@functools.partial(jax.jit, static_argnames=("tile_b", "act_in_bf16"))
def neural_network_forward(x, w1_k, w2_k, w3_k, *, tile_b=None, act_in_bf16=True):
    """x: (B, 3) f32; w*_k from prepare_params().  Returns (B, 1) f32.
    Set act_in_bf16=False on v5e (no bf16 VPU/EUP)."""
    B, in_f = x.shape
    assert in_f == 3, "C2P network takes 3 input features"
    h1p, h2p = w1_k.shape[0], w2_k.shape[0]
    assert w1_k.shape == (h1p, 8) and w2_k.shape == (h2p, h1p) and w3_k.shape == (8, h2p)

    if tile_b is None:
        tile_b = _pick_tile_b(B)
    assert B % tile_b == 0, "batch must be a multiple of tile_b"
    assert tile_b == B or tile_b % 128 == 0, "partial-batch tiles must be lane aligned"

    f32 = jnp.float32
    # Augmented transposed input: rows 0..2 = x^T, row 3 = 1.0 (bias), rows 4..7 = 0.
    x_aug = jnp.zeros((8, B), f32)
    x_aug = x_aug.at[0:3, :].set(x.astype(f32).T)
    x_aug = x_aug.at[3, :].set(1.0)

    act_dtype = jnp.bfloat16 if act_in_bf16 else f32
    kernel = functools.partial(_mlp_kernel, act_dtype=act_dtype)

    grid = (B // tile_b,)
    resident = lambda r, c: pl.BlockSpec((r, c), lambda i: (0, 0))   # constant index_map

    out = pl.pallas_call(
        kernel,
        out_shape=jax.ShapeDtypeStruct((1, B), f32),
        grid_spec=pltpu.PrefetchScalarGridSpec(
            num_scalar_prefetch=0,
            grid=grid,
            in_specs=[
                pl.BlockSpec((8, tile_b), lambda i: (0, i)),   # x tile (batch on lanes)
                resident(h1p, 8),                              # w1 (+b1 folded)
                resident(h2p, h1p),                            # w2 (+b2 folded)
                resident(8, h2p),                              # w3 (+b3 folded)
            ],
            out_specs=pl.BlockSpec((1, tile_b), lambda i: (0, i)),   # lane-dense
        ),
        compiler_params=pltpu.CompilerParams(
            dimension_semantics=("parallel",),     # batch tiles across TCs on v7x
        ),
    )(x_aug, w1_k, w2_k, w3_k)

    return out.reshape(B, 1)


def _init_linear(key, fan_in, fan_out):
    """PyTorch-style nn.Linear init, PyTorch layout: w (out, in), b (out,)."""
    kw, kb = jax.random.split(key)
    bound = 1.0 / jnp.sqrt(jnp.float32(fan_in))
    w = jax.random.uniform(kw, (fan_out, fan_in), jnp.float32, -bound, bound)
    b = jax.random.uniform(kb, (fan_out,), jnp.float32, -bound, bound)
    return w, b


def _reference_forward(x, w1, b1, w2, b2, w3, b3):
    """Plain-JAX f32 reference of the PyTorch forward."""
    h = jax.nn.sigmoid(x @ w1.T + b1)
    h = jax.nn.sigmoid(h @ w2.T + b2)
    return h @ w3.T + b3


if __name__ == "__main__":
    # Module defaults: in=3, h1=600, h2=200, out=1.
    H1, H2 = 600, 200
    B = 256                      # small batch -> two lane-aligned tiles of 128

    key = jax.random.PRNGKey(0)
    kx, k1, k2, k3 = jax.random.split(key, 4)

    x = jax.random.normal(kx, (B, 3), jnp.float32)
    w1, b1 = _init_linear(k1, 3, H1)
    w2, b2 = _init_linear(k2, H1, H2)
    w3, b3 = _init_linear(k3, H2, 1)

    # One-time weight packing (model-load time), then the hot forward call.
    w1_k, w2_k, w3_k = prepare_params(w1, b1, w2, b2, w3, b3, use_bf16=True)
    out = neural_network_forward(x, w1_k, w2_k, w3_k)
    out = jax.block_until_ready(out)

    ref = _reference_forward(x, w1, b1, w2, b2, w3, b3)
    assert out.shape == (B, 1)
    # bf16 MXU operands + bf16 activation path => slightly loose check.
    assert jnp.allclose(out, ref, atol=3e-2, rtol=3e-2), "mismatch vs JAX reference"

    print("KERNEL_OK")
</pallas_src>

<mosaic_0001>
module attributes {stable_mosaic.version = 11 : i64} {
  func.func @_mlp_kernel(%arg0: i32, %arg1: memref<8x128xf32, #tpu.memory_space<vmem>>, %arg2: memref<640x8xbf16, #tpu.memory_space<vmem>>, %arg3: memref<256x640xbf16, #tpu.memory_space<vmem>>, %arg4: memref<8x256xbf16, #tpu.memory_space<vmem>>, %arg5: memref<1x128xf32, #tpu.memory_space<vmem>>) attributes {dimension_semantics = [#tpu.dimension_semantics<parallel>], iteration_bounds = array<i64: 2>, scalar_prefetch = 0 : i64, scratch_operands = 0 : i64, tpu.core_type = #tpu.core_type<tc>, window_params = [{transform_indices = @transform_0, window_bounds = array<i64: 8, 128>}, {pipeline_mode = #tpu.pipeline_mode<synchronous>, transform_indices = @transform_1, window_bounds = array<i64: 640, 8>}, {pipeline_mode = #tpu.pipeline_mode<synchronous>, transform_indices = @transform_2, window_bounds = array<i64: 256, 640>}, {pipeline_mode = #tpu.pipeline_mode<synchronous>, transform_indices = @transform_3, window_bounds = array<i64: 8, 256>}, {transform_indices = @transform_4, window_bounds = array<i64: 1, 128>}]} {
    %c0 = arith.constant 0 : index
    %c0_0 = arith.constant 0 : index
    %0 = vector.load %arg1[%c0, %c0_0] : memref<8x128xf32, #tpu.memory_space<vmem>>, vector<8x128xf32>
    %1 = arith.truncf %0 : vector<8x128xf32> to vector<8x128xbf16>
    %c0_1 = arith.constant 0 : index
    %c0_2 = arith.constant 0 : index
    %2 = vector.load %arg2[%c0_1, %c0_2] : memref<640x8xbf16, #tpu.memory_space<vmem>>, vector<640x8xbf16>
    %cst = arith.constant dense<0.000000e+00> : vector<640x128xf32>
    %3 = tpu.matmul %2, %1, %cst {dimension_numbers = #tpu.dot_dimension_numbers<[1], [0], [0], [1], [0, 0, 1, 1], [], []>} : vector<640x8xbf16>, vector<8x128xbf16>, vector<640x128xf32> -> vector<640x128xf32>
    %4 = arith.truncf %3 : vector<640x128xf32> to vector<640x128xbf16>
    %cst_3 = arith.constant 5.000000e-01 : bf16
    %5 = vector.broadcast %cst_3 : bf16 to vector<640x128xbf16>
    %6 = arith.mulf %5, %4 : vector<640x128xbf16>
    %7 = math.tanh %6 : vector<640x128xbf16>
    %cst_4 = arith.constant 5.000000e-01 : bf16
    %8 = vector.broadcast %cst_4 : bf16 to vector<640x128xbf16>
    %9 = arith.mulf %8, %7 : vector<640x128xbf16>
    %cst_5 = arith.constant 5.000000e-01 : bf16
    %10 = vector.broadcast %cst_5 : bf16 to vector<640x128xbf16>
    %11 = arith.addf %9, %10 : vector<640x128xbf16>
    %c0_6 = arith.constant 0 : index
    %c0_7 = arith.constant 0 : index
    %12 = vector.load %arg3[%c0_6, %c0_7] : memref<256x640xbf16, #tpu.memory_space<vmem>>, vector<256x640xbf16>
    %cst_8 = arith.constant dense<0.000000e+00> : vector<256x128xf32>
    %13 = tpu.matmul %12, %11, %cst_8 {dimension_numbers = #tpu.dot_dimension_numbers<[1], [0], [0], [1], [0, 0, 1, 1], [], []>} : vector<256x640xbf16>, vector<640x128xbf16>, vector<256x128xf32> -> vector<256x128xf32>
    %14 = arith.truncf %13 : vector<256x128xf32> to vector<256x128xbf16>
    %cst_9 = arith.constant 5.000000e-01 : bf16
    %15 = vector.broadcast %cst_9 : bf16 to vector<256x128xbf16>
    %16 = arith.mulf %15, %14 : vector<256x128xbf16>
    %17 = math.tanh %16 : vector<256x128xbf16>
    %cst_10 = arith.constant 5.000000e-01 : bf16
    %18 = vector.broadcast %cst_10 : bf16 to vector<256x128xbf16>
    %19 = arith.mulf %18, %17 : vector<256x128xbf16>
    %cst_11 = arith.constant 5.000000e-01 : bf16
    %20 = vector.broadcast %cst_11 : bf16 to vector<256x128xbf16>
    %21 = arith.addf %19, %20 : vector<256x128xbf16>
    %c0_12 = arith.constant 0 : index
    %c0_13 = arith.constant 0 : index
    %22 = vector.load %arg4[%c0_12, %c0_13] : memref<8x256xbf16, #tpu.memory_space<vmem>>, vector<8x256xbf16>
    %cst_14 = arith.constant dense<0.000000e+00> : vector<8x128xf32>
    %23 = tpu.matmul %22, %21, %cst_14 {dimension_numbers = #tpu.dot_dimension_numbers<[1], [0], [0], [1], [0, 0, 1, 1], [], []>} : vector<8x256xbf16>, vector<256x128xbf16>, vector<8x128xf32> -> vector<8x128xf32>
    %24 = vector.extract_strided_slice %23 {offsets = [0, 0], sizes = [1, 128], strides = [1, 1]} : vector<8x128xf32> to vector<1x128xf32>
    %c0_15 = arith.constant 0 : index
    %c0_16 = arith.constant 0 : index
    %25 = vector.load %arg5[%c0_15, %c0_16] : memref<1x128xf32, #tpu.memory_space<vmem>>, vector<1x128xf32>
    tpu.vector_store %arg5[%c0_15, %c0_16], %24 {strides = array<i32>} : memref<1x128xf32, #tpu.memory_space<vmem>>, vector<1x128xf32>,
    return
  }
  func.func @transform_0(%arg0: i32) -> (i32, i32) {
    %c0_i32 = arith.constant 0 : i32
    %c0_i32_0 = arith.constant 0 : i32
    return %c0_i32, %arg0 : i32, i32
  }
  func.func @transform_1(%arg0: i32) -> (i32, i32) {
    %c0_i32 = arith.constant 0 : i32
    %c0_i32_0 = arith.constant 0 : i32
    %c0_i32_1 = arith.constant 0 : i32
    return %c0_i32, %c0_i32_0 : i32, i32
  }
  func.func @transform_2(%arg0: i32) -> (i32, i32) {
    %c0_i32 = arith.constant 0 : i32
    %c0_i32_0 = arith.constant 0 : i32
    %c0_i32_1 = arith.constant 0 : i32
    return %c0_i32, %c0_i32_0 : i32, i32
  }
  func.func @transform_3(%arg0: i32) -> (i32, i32) {
    %c0_i32 = arith.constant 0 : i32
    %c0_i32_0 = arith.constant 0 : i32
    %c0_i32_1 = arith.constant 0 : i32
    return %c0_i32, %c0_i32_0 : i32, i32
  }
  func.func @transform_4(%arg0: i32) -> (i32, i32) {
    %c0_i32 = arith.constant 0 : i32
    %c0_i32_0 = arith.constant 0 : i32
    return %c0_i32, %arg0 : i32, i32
  }
}

</mosaic_0001>

<bundles_post_ra>
// kernel: neural_network_forward.1
= control target key start
LH: loop header
LB: loop body
LE: loop exit
PB: predicated region body
PF: predicated region fallthrough
CT: control target
= control target key end

     0   :  { %9 = vsyncpa [#allocation3], 0  ;;  %s4043_s0 = inlined_call_operand.vmem [shape: f32[8,256], index: 0, kind: input, shape index: {}]   ;;  %s4044_s1 = inlined_call_operand.vmem [shape: bf16[640,8], index: 1, kind: input, shape index: {}]   ;;  %s4045_s2 = inlined_call_operand.hbm [shape: bf16[256,640], index: 2, kind: input, shape index: {}]   ;;  %s4046_s3 = inlined_call_operand.vmem [shape: bf16[8,256], index: 3, kind: input, shape index: {}]   ;;  %s4047_s4 = inlined_call_operand.hbm [shape: f32[1,256], index: 4, kind: output, shape index: {}]  }
   0x1   :  { %10 = vsyncpa [#allocation4], 0 }
   0x2   :  { %12 = vsyncpa [#allocation4 + $0x1], 0  ;;  %s3430_s15 = smov 0   ;;  %s3432_s16 = smov 0  }
   0x3   :  { %s3434_s17 = smov 0   ;;  %s3436_s18 = smov 0  }
   0x4 LB: > { %s3451_s19 = sadd.s32 4294967295, %s3399_s18   ;;  %s2373_s20 = sadd.s32 4294967294, %s3399_s18   ;;  %s3399_s18 = sphi %s3436_s18, %s4087_s18   ;;  %s3395_s17 = sphi %s3434_s17, %s4086_s17   ;;  %s3391_s16 = sphi %s3432_s16, %s4085_s16   ;;  %s3387_s15 = sphi %s3430_s15, %s4084_s15  }
   0x5   : > { %s3455_s21 = sadd.s32 1, %s3399_s18   ;;  %s114_s22 = sadd.s32 1, %s3395_s17 }
   0x6   : > { %s111_s23 = ssub.s32 %s3399_s18, %s3455_s21  ;;  %p124_p0 = scmp.ne.s32.totalorder %s3395_s17, %s3391_s16 }
   0x7   : > { %p112_p1 = scmp.eq.s32.totalorder %s111_s23, 0  ;;  %p125_p2 = scmp.eq.s32.totalorder %s3451_s19, 1 }
   0x8   : > { %p130_p3 = scmp.ne.s32.totalorder %s3391_s16, %s3387_s15  ;;  %p131_p4 = scmp.eq.s32.totalorder %s2373_s20, 1 }
   0x9   : > { %s3466_s24 = scalar_select %p112_p1, %s3395_s17, %s114_s22  }
   0xa   : > { %p3468_p5 = por %p125_p2, %p124_p0  ;;  %p3472_p6 = por %p131_p4, %p130_p3 }
   0xb   : > { %p2374_p7 = scmp.ge.s32.totalorder %s3399_s18, 1  ;;  %p138_p8 = scmp.lt.s32.totalorder %s3399_s18, 3 }
   0xc   : > { %s4052_s25 = scalar_select %p3468_p5, 1, 0 }
   0xd   : > { %s4053_s26 = scalar_select %p3472_p6, 1, 0 }
   0xe   : > { %p4048_p9 = scmp.eq.s32.totalorder %s3451_s19, 0  ;;  %p3479_p10 = pnand %p2374_p7, %p138_p8 }
   0xf   : > { %s3401_s28 = smov [#allocation2]   ;;  %s3305_s7 = scalar_lea.hbm %s4045_s2, 10240 }
  0x10   : > { %s4054_s27 = scalar_select %p3479_p10, 1, 0 }
  0x11   : > { %s153_s29 = sshll.u32 %s3401_s28, 4  ;;  %p2993_p11 = pneg %p3479_p10  ;;  %s154_s29 = int_to_ptr.vmem [resolvable:$true] %s153_s29 }
  0x12   : > { %p3306_p13 = scmp.ne.s32.totalorder %s4045_s2, %s3305_s7  ;;  %p3312_p3 = scmp.lt.u32.totalorder %s3305_s7, %s4045_s2 }
  0x13   : > { %p3487_p12 = pnand %p4048_p9, %p2993_p11 }
  0x15   : > { %p3307_p0 = pneg %p3487_p12 }
  0x17   : > { %p3308_p1 = pnand %p3307_p0, %p3306_p13 }
  0x19   : > { %p3309_p2 = pneg %p3308_p1 }
  0x1b   : > { %p3314_p4 = pnand %p3312_p3, %p3309_p2 }
  0x1d   : > { %3317 = shalt.err (!%p3314_p4)
}
  0x1e   : > { %s3318_s12 = scalar_lea.vmem %s154_s29, 10240  ;;  %p3326_p9 = scmp.lt.s32.totalorder %s154_s29, %s154_s29 }
  0x1f   : > { %p3319_p7 = scmp.ne.s32.totalorder %s154_s29, %s3318_s12  ;;  %p3327_p6 = scmp.lt.s32.totalorder %s3318_s12, %s3318_s12 }
  0x21   : > { %p3321_p8 = pnand %p3319_p7, %p3307_p0  ;;  %p3328_p5 = por %p3327_p6, %p3326_p9 }
  0x23   : > { %p3322_p11 = pneg %p3321_p8 }
  0x25   : > { %p3329_p10 = pnand %p3328_p5, %p3322_p11 }
  0x27   : > { %3332 = shalt.err (!%p3329_p10)
}
  0x28   : > { %s3402_s13 = smov 320   ;;  %s3403_s14 = smov 20  }
  0x29   : > { %2996 = dma.hbm_to_vmem [thread:$0]  (!%p3487_p12), %s4045_s2, 10240, %s154_s29, [#allocation3], %s3402_s13, %s3402_s13, %s3403_s14  }
  0x2a   : > { %p4056_p13 = scmp.ne.s32.totalorder %s4054_s27, 0 }
  0x2c   : > { %179 = sbr.rel (%p4056_p13) target bundleno = 1088 (0x440), region = 36 }
  0x33   : > { %p4057_p1 = scmp.eq.s32.totalorder %s3451_s19, 0 }
  0x35   : > { %3378 = dma.done.wait (%p4057_p1), [#allocation3], 10240   ;;  %p4058_p0 = pmov %p4057_p1 }
  0x36   : > { %p203_p5 = scmp.lt.s32.totalorder %s3451_s19, 1  ;;  %vm612_vm0 = vcmask 1043456   ;;  %vm491_vm1 = vcmask 64512   ;;  %v3039_v2 = vld [vmem:[%s4044_s1] sm:$0xff]   ;;  %v3040_v4 = vld [vmem:[%s4044_s1 + $0x8] sm:$0xff]   ;;  %v3041_v5 = vld [vmem:[%s4044_s1 + $0x10] sm:$0xff]  }
  0x37   : > { %3380 = vsyncadd (%p4058_p0), [#allocation3], 4294957056  ;;  %2858 = vmatprep.mubr.msk.bf16.mxu0 %vm491_vm1, %v3039_v2  ;;  %v3042_v6 = vld [vmem:[%s4044_s1 + $0x18] sm:$0xff]   ;;  %v3043_v7 = vld [vmem:[%s4044_s1 + $0x20] sm:$0xff]   ;;  %s201_s5 = sand.u32 1, %s3391_s16   ;;  %s2542_s30 = sshll.u32 %s3451_s19, 4 }
  0x38   : > { %s204_s23 = scalar_select %p203_p5, %s3451_s19, 1  ;;  %v3044_v8 = vld [vmem:[%s4044_s1 + $0x28] sm:$0xff]   ;;  %v3045_v9 = vld [vmem:[%s4044_s1 + $0x30] sm:$0xff]   ;;  %v3046_v10 = vld [vmem:[%s4044_s1 + $0x38] sm:$0xff]  }
  0x39   : > { %v3047_v11 = vld [vmem:[%s4044_s1 + $0x40] sm:$0xff]   ;;  %v3048_v12 = vld [vmem:[%s4044_s1 + $0x48] sm:$0xff]   ;;  %v3049_v13 = vld [vmem:[%s4044_s1 + $0x50] sm:$0xff]   ;;  %s4001_s8 = scalar_lea.hbm %s4047_s4, %s2542_s30  ;;  %s2294_s9 = scalar_lea.sflag [#allocation4], %s201_s5 }
  0x3a   : > { %s2379_s28 = sshll.u32 %s204_s23, 3  ;;  %v3050_v14 = vld [vmem:[%s4044_s1 + $0x58] sm:$0xff]   ;;  %v3051_v15 = vld [vmem:[%s4044_s1 + $0x60] sm:$0xff]   ;;  %v3052_v16 = vld [vmem:[%s4044_s1 + $0x68] sm:$0xff]   ;;  %p4082_p9 = scmp.ne.s32.totalorder %s4052_s25, 0 }
  0x3b   : > { %s206_s6 = scalar_lea.vmem %s4043_s0, %s2379_s28  ;;  %v3053_v17 = vld [vmem:[%s4044_s1 + $0x70] sm:$0xff]   ;;  %v3054_v18 = vld [vmem:[%s4044_s1 + $0x78] sm:$0xff]   ;;  %v3055_v19 = vld [vmem:[%s4044_s1 + $0x80] sm:$0xff]   ;;  %s3404_s10 = smov [#allocation5]  }
  0x3c   : > { %v209_v0 = vld [vmem:[%s206_s6] sm:$0xff]  ;;  %v3056_v20 = vld [vmem:[%s4044_s1 + $0x88] sm:$0xff]   ;;  %v3057_v21 = vld [vmem:[%s4044_s1 + $0x90] sm:$0xff]   ;;  %s202_s6 = scalar_lea.vmem [#allocation5], %s201_s5  ;;  %s3337_s11 = sshll.u32 %s3404_s10, 4  ;;  %s3338_s11 = int_to_ptr.vmem [resolvable:$false] %s3337_s11 }
  0x3d   : > { %v210_v1 = vpack.c.bf16 %v209_v0, %v209_v0  ;;  %v3058_v22 = vld [vmem:[%s4044_s1 + $0x98] sm:$0xff]   ;;  %v3059_v23 = vld [vmem:[%s4044_s1 + $0xa0] sm:$0xff]   ;;  %v3060_v24 = vld [vmem:[%s4044_s1 + $0xa8] sm:$0xff]   ;;  %s2306_s27 = sshll.u32 %s202_s6, 4  ;;  %s3339_s12 = scalar_lea.vmem %s3338_s11, 32  ;;  %s4003_s27 = int_to_ptr.vmem [resolvable:$true] %s2306_s27 }
  0x3e   : > { %v3061_v25 = vld [vmem:[%s4044_s1 + $0xb0] sm:$0xff]   ;;  %v3062_v26 = vld [vmem:[%s4044_s1 + $0xb8] sm:$0xff]   ;;  %v3063_v27 = vld [vmem:[%s4044_s1 + $0xc0] sm:$0xff]   ;;  %s3333_s19 = scalar_lea.vmem %s4003_s27, 16  ;;  %p3340_p2 = scmp.lt.s32.totalorder %s4003_s27, %s3338_s11 }
  0x3f   : > { %2986 = vmatprep.subr.msk.bf16.mxu0 %vm612_vm0, %v210_v1  ;;  %v614_v3 = vsel %vm612_vm0, %v210_v1, 0  ;;  %v3064_v28 = vld [vmem:[%s4044_s1 + $0xc8] sm:$0xff]   ;;  %v3065_v29 = vld [vmem:[%s4044_s1 + $0xd0] sm:$0xff]   ;;  %v3066_v30 = vld [vmem:[%s4044_s1 + $0xd8] sm:$0xff]   ;;  %p3334_p6 = scmp.ne.s32.totalorder %s4003_s27, %s3333_s19  ;;  %p3341_p3 = scmp.lt.s32.totalorder %s3339_s12, %s3333_s19 }
  0x40   : > { %2857 = vmatpush3.bf16.msra.mxu0 %v614_v3  ;;  %v3067_v31 = vld [vmem:[%s4044_s1 + $0xe0] sm:$0xff]   ;;  %v3068_v32 = vld [vmem:[%s4044_s1 + $0xe8] sm:$0xff]   ;;  %v3069_v33 = vld [vmem:[%s4044_s1 + $0xf0] sm:$0xff]  }
  0x41   : > { %v3070_v34 = vld [vmem:[%s4044_s1 + $0xf8] sm:$0xff]   ;;  %v3071_v35 = vld [vmem:[%s4044_s1 + $0x100] sm:$0xff]   ;;  %v3072_v36 = vld [vmem:[%s4044_s1 + $0x108] sm:$0xff]   ;;  %p3335_p10 = pnand %p3334_p6, %p4082_p9  ;;  %p3342_p4 = por %p3341_p3, %p3340_p2 }
  0x42   : > { %v3073_v37 = vld [vmem:[%s4044_s1 + $0x110] sm:$0xff]   ;;  %v3074_v38 = vld [vmem:[%s4044_s1 + $0x118] sm:$0xff]   ;;  %v3075_v39 = vld [vmem:[%s4044_s1 + $0x120] sm:$0xff]  }
  0x43   : > { %2859 = vmatmul.mubr.msk.bf16.vlgmr.msra.gmra.mrb[0].mxu0 %vm491_vm1, %v3040_v4  ;;  %v3076_v40 = vld [vmem:[%s4044_s1 + $0x128] sm:$0xff]   ;;  %v3077_v41 = vld [vmem:[%s4044_s1 + $0x130] sm:$0xff]   ;;  %v3078_v42 = vld [vmem:[%s4044_s1 + $0x138] sm:$0xff]   ;;  %p3336_p12 = pneg %p3335_p10 }
  0x44   : > { %2862 = vmatprep.mubr.msk.bf16.mxu0 %vm491_vm1, %v3041_v5  ;;  %v3081_v43 = vld [vmem:[#allocation2 + $0x4] ss:$20 sps:$4 sm:$0xff]  }
  0x45   : > { %1713 = vmatprep.mubr.bf16.mxu1 %v3081_v43  ;;  %p3343_p7 = pnand %p3342_p4, %p3336_p12 }
  0x4b   : > { %2863 = vmatmul.mubr.msk.bf16.gmra.mrb[4].mxu0 %vm491_vm1, %v3042_v6 }
  0x4c   : > { %2866 = vmatprep.mubr.msk.bf16.mxu0 %vm491_vm1, %v3043_v7 }
  0x53   : > { %2867 = vmatmul.mubr.msk.bf16.gmra.mrb[8].mxu0 %vm491_vm1, %v3044_v8 }
  0x54   : > { %2870 = vmatprep.mubr.msk.bf16.mxu0 %vm491_vm1, %v3045_v9 }
  0x5b   : > { %2871 = vmatmul.mubr.msk.bf16.gmra.mrb[12].mxu0 %vm491_vm1, %v3046_v10 }
  0x5c   : > { %2874 = vmatprep.mubr.msk.bf16.mxu0 %vm491_vm1, %v3047_v11 }
  0x63   : > { %2875 = vmatmul.mubr.msk.bf16.gmra.mrb[16].mxu0 %vm491_vm1, %v3048_v12 }
  0x64   : > { %2878 = vmatprep.mubr.msk.bf16.mxu0 %vm491_vm1, %v3049_v13 }
  0x6b   : > { %2879 = vmatmul.mubr.msk.bf16.gmra.mrb[20].mxu0 %vm491_vm1, %v3050_v14 }
  0x6c   : > { %2882 = vmatprep.mubr.msk.bf16.mxu0 %vm491_vm1, %v3051_v15 }
  0x73   : > { %2883 = vmatmul.mubr.msk.bf16.gmra.mrb[24].mxu0 %vm491_vm1, %v3052_v16 }
  0x74   : > { %2886 = vmatprep.mubr.msk.bf16.mxu0 %vm491_vm1, %v3053_v17 }
  0x7b   : > { %2887 = vmatmul.mubr.msk.bf16.gmra.mrb[28].mxu0 %vm491_vm1, %v3054_v18 }
  0x7c   : > { %2890 = vmatprep.mubr.msk.bf16.mxu0 %vm491_vm1, %v3055_v19 }
  0x83   : > { %2891 = vmatmul.mubr.msk.bf16.gmra.mrb[32].mxu0 %vm491_vm1, %v3056_v20 }
  0x84   : > { %2894 = vmatprep.mubr.msk.bf16.mxu0 %vm491_vm1, %v3057_v21 }
  0x8b   : > { %2895 = vmatmul.mubr.msk.bf16.gmra.mrb[36].mxu0 %vm491_vm1, %v3058_v22 }
  0x8c   : > { %2898 = vmatprep.mubr.msk.bf16.mxu0 %vm491_vm1, %v3059_v23 }
  0x93   : > { %2899 = vmatmul.mubr.msk.bf16.gmra.mrb[40].mxu0 %vm491_vm1, %v3060_v24 }
  0x94   : > { %2902 = vmatprep.mubr.msk.bf16.mxu0 %vm491_vm1, %v3061_v25 }
  0x9b   : > { %2903 = vmatmul.mubr.msk.bf16.gmra.mrb[44].mxu0 %vm491_vm1, %v3062_v26 }
  0x9c   : > { %2906 = vmatprep.mubr.msk.bf16.mxu0 %vm491_vm1, %v3063_v27 }
  0xa3   : > { %2907 = vmatmul.mubr.msk.bf16.gmra.mrb[48].mxu0 %vm491_vm1, %v3064_v28 }
  0xa4   : > { %2910 = vmatprep.mubr.msk.bf16.mxu0 %vm491_vm1, %v3065_v29 }
  0xab   : > { %2911 = vmatmul.mubr.msk.bf16.gmra.mrb[52].mxu0 %vm491_vm1, %v3066_v30 }
  0xac   : > { %2914 = vmatprep.mubr.msk.bf16.mxu0 %vm491_vm1, %v3067_v31 }
  0xb3   : > { %2915 = vmatmul.mubr.msk.bf16.gmra.mrb[56].mxu0 %vm491_vm1, %v3068_v32 }
  0xb4   : > { %2918 = vmatprep.mubr.msk.bf16.mxu0 %vm491_vm1, %v3069_v33 }
  0xbb   : > { %2919 = vmatmul.mubr.msk.bf16.gmra.mrb[60].mxu0 %vm491_vm1, %v3070_v34 }
  0xbc   : > { %2922 = vmatprep.mubr.msk.bf16.mxu0 %vm491_vm1, %v3071_v35 }
  0xc3   : > { %2923 = vmatmul.mubr.msk.bf16.gmra.mrb[64].mxu0 %vm491_vm1, %v3072_v36 }
  0xc4   : > { %2926 = vmatprep.mubr.msk.bf16.mxu0 %vm491_vm1, %v3073_v37 }
  0xcb   : > { %2927 = vmatmul.mubr.msk.bf16.gmra.mrb[68].mxu0 %vm491_vm1, %v3074_v38 }
  0xcc   : > { %2930 = vmatprep.mubr.msk.bf16.mxu0 %vm491_vm1, %v3075_v39 }
  0xd3   : > { %2931 = vmatmul.mubr.msk.bf16.gmra.mrb[72].mxu0 %vm491_vm1, %v3076_v40 }
  0xd4   : > { %2934 = vmatprep.mubr.msk.bf16.mxu0 %vm491_vm1, %v3077_v41 }
  0xdb   : > { %2935 = vmatmul.mubr.msk.bf16.gmra.mrb[76].mxu0 %vm491_vm1, %v3078_v42 }
 0x116   : > { %v2860_v44 = vpop.f32.mrb[0].mxu0 }
 0x117   : > { %v650_v45 = vpop.f32.mrb[1].mxu0 }
 0x118   : > { %v2861_v46 = vpop.f32.mrb[2].mxu0 }
 0x119   : > { %v970_v47 = vpack.c.bf16 %v2861_v46, %v2860_v44  ;;  %v653_v48 = vpop.f32.mrb[3].mxu0 }
 0x11a   : > { %v969_v49 = vpack.c.bf16 %v653_v48, %v650_v45 }
 0x11b   : > { %v1010_v11 = vmul.bf16 1056980736, %v970_v47 }
 0x11c   : > { %v1009_v5 = vmul.bf16 1056980736, %v969_v49 }
 0x11e   : > { %v2864_v50 = vpop.f32.mrb[4].mxu0  ;;  %3193 = vtanh.bf16 %v1009_v5 }
 0x11f   : > { %v666_v51 = vpop.f32.mrb[5].mxu0 }
 0x120   : > { %v2865_v52 = vpop.f32.mrb[6].mxu0 }
 0x121   : > { %v972_v53 = vpack.c.bf16 %v2865_v52, %v2864_v50  ;;  %v669_v54 = vpop.f32.mrb[7].mxu0 }
 0x122   : > { %v971_v55 = vpack.c.bf16 %v669_v54, %v666_v51 }
 0x123   : > { %v1012_v21 = vmul.bf16 1056980736, %v972_v53 }
 0x124   : > { %v1011_v15 = vmul.bf16 1056980736, %v971_v55 }
 0x126   : > { %v2868_v56 = vpop.f32.mrb[8].mxu0 }
 0x127   : > { %v682_v57 = vpop.f32.mrb[9].mxu0 }
 0x128   : > { %v2869_v58 = vpop.f32.mrb[10].mxu0 }
 0x129   : > { %v974_v59 = vpack.c.bf16 %v2869_v58, %v2868_v56  ;;  %v685_v60 = vpop.f32.mrb[11].mxu0  ;;  %v3194_v24 = vpop.eup %3193 }
 0x12a   : > { %v973_v61 = vpack.c.bf16 %v685_v60, %v682_v57  ;;  %v1089_v33 = vmul.bf16 1056980736, %v3194_v24 }
 0x12b   : > { %v1014_v38 = vmul.bf16 1056980736, %v974_v59 }
 0x12c   : > { %v1013_v26 = vmul.bf16 1056980736, %v973_v61  ;;  %v1129_v42 = vadd.bf16 1056980736, %v1089_v33 }
 0x12e   : > { %v3678_v62 = vpop.f32.mrb[12].mxu0 }
 0x12f   : > { %v698_v63 = vpop.f32.mrb[13].mxu0 }
 0x130   : > { %v3680_v0 = vpop.f32.mrb[14].mxu0 }
 0x131   : > { %v976_v1 = vpack.c.bf16 %v3680_v0, %v3678_v62  ;;  %v701_v2 = vpop.f32.mrb[15].mxu0 }
 0x132   : > { %v975_v3 = vpack.c.bf16 %v701_v2, %v698_v63 }
 0x133   : > { %v1016_v60 = vmul.bf16 1056980736, %v976_v1 }
 0x134   : > { %v1015_v47 = vmul.bf16 1056980736, %v975_v3 }
 0x136   : > { %v2876_v4 = vpop.f32.mrb[16].mxu0 }
 0x137   : > { %v714_v6 = vpop.f32.mrb[17].mxu0 }
 0x138   : > { %v2877_v7 = vpop.f32.mrb[18].mxu0 }
 0x139   : > { %v978_v8 = vpack.c.bf16 %v2877_v7, %v2876_v4  ;;  %v717_v9 = vpop.f32.mrb[19].mxu0 }
 0x13a   : > { %v977_v10 = vpack.c.bf16 %v717_v9, %v714_v6 }
 0x13b   : > { %v1018_v12 = vmul.bf16 1056980736, %v978_v8 }
 0x13c   : > { %v1017_v13 = vmul.bf16 1056980736, %v977_v10 }
 0x13d   : > { %3195 = vtanh.bf16 %v1018_v12 }
 0x13e   : > { %3197 = vtanh.bf16 %v1017_v13  ;;  %v2880_v14 = vpop.f32.mrb[20].mxu0 }
 0x13f   : > { %3199 = vtanh.bf16 %v1010_v11  ;;  %v730_v16 = vpop.f32.mrb[21].mxu0 }
 0x140   : > { %v2881_v17 = vpop.f32.mrb[22].mxu0  ;;  %3201 = vtanh.bf16 %v1011_v15 }
 0x141   : > { %v980_v18 = vpack.c.bf16 %v2881_v17, %v2880_v14  ;;  %v733_v19 = vpop.f32.mrb[23].mxu0 }
 0x142   : > { %v979_v20 = vpack.c.bf16 %v733_v19, %v730_v16 }
 0x143   : > { %v1020_v22 = vmul.bf16 1056980736, %v980_v18 }
 0x144   : > { %v1019_v23 = vmul.bf16 1056980736, %v979_v20 }
 0x145   : > { %3203 = vtanh.bf16 %v1020_v22 }
 0x146   : > { %3205 = vtanh.bf16 %v1019_v23  ;;  %v2884_v25 = vpop.f32.mrb[24].mxu0 }
 0x147   : > { %3207 = vtanh.bf16 %v1012_v21  ;;  %v746_v27 = vpop.f32.mrb[25].mxu0 }
 0x148   : > { %v3196_v28 = vpop.eup %3195  ;;  %v2885_v29 = vpop.f32.mrb[26].mxu0  ;;  %3209 = vtanh.bf16 %v1013_v26 }
 0x149   : > { %v3198_v30 = vpop.eup %3197  ;;  %v982_v31 = vpack.c.bf16 %v2885_v29, %v2884_v25  ;;  %v749_v32 = vpop.f32.mrb[27].mxu0  ;;  %v1098_v37 = vmul.bf16 1056980736, %v3196_v28 }
 0x14a   : > { %v3200_v34 = vpop.eup %3199  ;;  %v981_v35 = vpack.c.bf16 %v749_v32, %v746_v27  ;;  %v1097_v36 = vmul.bf16 1056980736, %v3198_v30 }
 0x14b   : > { %v1022_v39 = vmul.bf16 1056980736, %v982_v31  ;;  %v1090_v43 = vmul.bf16 1056980736, %v3200_v34  ;;  %v3202_v44 = vpop.eup %3201  ;;  %v1138_v46 = vadd.bf16 1056980736, %v1098_v37 }
 0x14c   : > { %v1021_v40 = vmul.bf16 1056980736, %v981_v35  ;;  %v1137_v41 = vadd.bf16 1056980736, %v1097_v36  ;;  %v1091_v55 = vmul.bf16 1056980736, %v3202_v44 }
 0x14d   : > { %3211 = vtanh.bf16 %v1022_v39  ;;  %v1130_v54 = vadd.bf16 1056980736, %v1090_v43 }
 0x14e   : > { %3213 = vtanh.bf16 %v1021_v40  ;;  %v2888_v45 = vpop.f32.mrb[28].mxu0  ;;  %2586 = vmatprep.subr.bf16.mxu1 %v1137_v41  ;;  %v1131_v3 = vadd.bf16 1056980736, %v1091_v55  ;;  %v3084_v55 = vld [vmem:[#allocation2 + $0x28] ss:$20 sps:$4 sm:$0xff]  }
 0x14f   : > { %3215 = vtanh.bf16 %v1014_v38  ;;  %v762_v48 = vpop.f32.mrb[29].mxu0  ;;  %2587 = vmatpush3.bf16.msra.mxu1 %v1129_v42 }
 0x150   : > { %v3204_v49 = vpop.eup %3203  ;;  %v2889_v50 = vpop.f32.mrb[30].mxu0  ;;  %2588 = vmatprep.subr.bf16.mxu1 %v1138_v46  ;;  %3217 = vtanh.bf16 %v1015_v47  ;;  %v3079_v46 = vld [vmem:[#allocation2] ss:$20 sps:$4 sm:$0xff]  }
 0x151   : > { %v3206_v51 = vpop.eup %3205  ;;  %v984_v52 = vpack.c.bf16 %v2889_v50, %v2888_v45  ;;  %v765_v53 = vpop.f32.mrb[31].mxu0  ;;  %v1100_v59 = vmul.bf16 1056980736, %v3204_v49  ;;  %v3082_v47 = vld [vmem:[#allocation2 + $0x2c] ss:$20 sps:$4 sm:$0xff]  }
 0x152   : > { %v3208_v56 = vpop.eup %3207  ;;  %v983_v57 = vpack.c.bf16 %v765_v53, %v762_v48  ;;  %v1099_v58 = vmul.bf16 1056980736, %v3206_v51  ;;  %v3130_v49 = vld [vmem:[#allocation2 + $0x10] ss:$20 sps:$4 sm:$0xff]  }
 0x153   : > { %v1024_v61 = vmul.bf16 1056980736, %v984_v52  ;;  %2589 = vmatpush3.bf16.msra.mxu1 %v1130_v54  ;;  %v1092_v4 = vmul.bf16 1056980736, %v3208_v56  ;;  %v3210_v5 = vpop.eup %3209  ;;  %v1140_v7 = vadd.bf16 1056980736, %v1100_v59  ;;  %2954 = vmatprep.mubr.bf16.mxu0 %v3130_v49 }
 0x154   : > { %v1023_v63 = vmul.bf16 1056980736, %v983_v57  ;;  %v1139_v2 = vadd.bf16 1056980736, %v1099_v58  ;;  %v1093_v12 = vmul.bf16 1056980736, %v3210_v5 }
 0x155   : > { %3219 = vtanh.bf16 %v1024_v61  ;;  %v1132_v11 = vadd.bf16 1056980736, %v1092_v4  ;;  %v3085_v56 = vld [vmem:[#allocation2 + $0x54] ss:$20 sps:$4 sm:$0xff]   ;;  %v3087_v4 = vld [vmem:[#allocation2 + $0x50] ss:$20 sps:$4 sm:$0xff]  }
 0x156   : > { %3221 = vtanh.bf16 %v1023_v63  ;;  %v3687_v6 = vpop.f32.mrb[32].mxu0  ;;  %2590 = vmatprep.subr.bf16.mxu1 %v1139_v2  ;;  %v1133_v18 = vadd.bf16 1056980736, %v1093_v12 }
 0x157   : > { %3223 = vtanh.bf16 %v1016_v60  ;;  %v3689_v8 = vpop.f32.mrb[33].mxu0  ;;  %2591 = vmatpush3.bf16.msra.mxu1 %v1131_v3 }
 0x158   : > { %v3212_v62 = vpop.eup %3211  ;;  %v3691_v0 = vpop.f32.mrb[34].mxu0  ;;  %2592 = vmatprep.subr.bf16.mxu1 %v1140_v7  ;;  %v3088_v7 = vld [vmem:[#allocation2 + $0x7c] ss:$20 sps:$4 sm:$0xff]  }
 0x159   : > { %v3214_v1 = vpop.eup %3213  ;;  %v986_v9 = vpack.c.bf16 %v3691_v0, %v3687_v6  ;;  %v781_v10 = vpop.f32.mrb[35].mxu0  ;;  %v1102_v16 = vmul.bf16 1056980736, %v3212_v62 }
 0x15a   : > { %v3216_v13 = vpop.eup %3215  ;;  %v985_v14 = vpack.c.bf16 %v781_v10, %v3689_v8  ;;  %v1101_v15 = vmul.bf16 1056980736, %v3214_v1 }
 0x15b   : > { %2593 = vmatpush3.bf16.msra.mxu1 %v1132_v11  ;;  %v1094_v19 = vmul.bf16 1056980736, %v3216_v13  ;;  %v3218_v20 = vpop.eup %3217  ;;  %v1142_v22 = vadd.bf16 1056980736, %v1102_v16  ;;  %v1026_v60 = vmul.bf16 1056980736, %v986_v9 }
 0x15c   : > { %v1141_v17 = vadd.bf16 1056980736, %v1101_v15  ;;  %v1095_v30 = vmul.bf16 1056980736, %v3218_v20  ;;  %v1025_v57 = vmul.bf16 1056980736, %v985_v14 }
 0x15d   : > { %v1134_v29 = vadd.bf16 1056980736, %v1094_v19  ;;  %v3090_v13 = vld [vmem:[#allocation2 + $0x78] ss:$20 sps:$4 sm:$0xff]  }
 0x15e   : > { %v3696_v21 = vpop.f32.mrb[36].mxu0  ;;  %2594 = vmatprep.subr.bf16.mxu1 %v1141_v17  ;;  %v1135_v36 = vadd.bf16 1056980736, %v1095_v30  ;;  %3225 = vtanh.bf16 %v1025_v57  ;;  %v3091_v15 = vld [vmem:[#allocation2 + $0xa4] ss:$20 sps:$4 sm:$0xff]  }
 0x15f   : > { %v794_v23 = vpop.f32.mrb[37].mxu0  ;;  %2595 = vmatpush3.bf16.msra.mxu1 %v1133_v18  ;;  %3227 = vtanh.bf16 %v1026_v60  ;;  %v3097_v60 = vld [vmem:[#allocation2 + $0xf4] ss:$20 sps:$4 sm:$0xff]  }
 0x160   : > { %v3220_v24 = vpop.eup %3219  ;;  %v3698_v25 = vpop.f32.mrb[38].mxu0  ;;  %2596 = vmatprep.subr.bf16.mxu1 %v1142_v22 }
 0x161   : > { %v3222_v26 = vpop.eup %3221  ;;  %v988_v27 = vpack.c.bf16 %v3698_v25, %v3696_v21  ;;  %v797_v28 = vpop.f32.mrb[39].mxu0  ;;  %v1104_v34 = vmul.bf16 1056980736, %v3220_v24 }
 0x162   : > { %v3224_v31 = vpop.eup %3223  ;;  %v987_v32 = vpack.c.bf16 %v797_v28, %v794_v23  ;;  %v1103_v33 = vmul.bf16 1056980736, %v3222_v26 }
 0x163   : > { %2597 = vmatpush3.bf16.msra.mxu1 %v1134_v29  ;;  %v1096_v37 = vmul.bf16 1056980736, %v3224_v31  ;;  %v1144_v39 = vadd.bf16 1056980736, %v1104_v34  ;;  %v1028_v11 = vmul.bf16 1056980736, %v988_v27 }
 0x164   : > { %v1143_v35 = vadd.bf16 1056980736, %v1103_v33  ;;  %v1027_v62 = vmul.bf16 1056980736, %v987_v32  ;;  %v3093_v31 = vld [vmem:[#allocation2 + $0xa0] ss:$20 sps:$4 sm:$0xff]  }
 0x165   : > { %v1136_v44 = vadd.bf16 1056980736, %v1096_v37  ;;  %v3094_v33 = vld [vmem:[#allocation2 + $0xcc] ss:$20 sps:$4 sm:$0xff]  }
 0x166   : > { %v3702_v38 = vpop.f32.mrb[40].mxu0  ;;  %2598 = vmatprep.subr.bf16.mxu1 %v1143_v35 }
 0x167   : > { %v810_v40 = vpop.f32.mrb[41].mxu0  ;;  %2599 = vmatpush3.bf16.msra.mxu1 %v1135_v36 }
 0x168   : > { %v3704_v41 = vpop.f32.mrb[42].mxu0  ;;  %2600 = vmatprep.subr.bf16.mxu1 %v1144_v39 }
 0x169   : > { %v990_v42 = vpack.c.bf16 %v3704_v41, %v3702_v38  ;;  %v813_v43 = vpop.f32.mrb[43].mxu0  ;;  %v3226_v16 = vpop.eup %3225 }
 0x16a   : > { %v989_v45 = vpack.c.bf16 %v813_v43, %v810_v40  ;;  %v3228_v20 = vpop.eup %3227  ;;  %v1105_v21 = vmul.bf16 1056980736, %v3226_v16 }
 0x16b   : > { %2601 = vmatpush3.bf16.msra.mxu1 %v1136_v44  ;;  %v1030_v24 = vmul.bf16 1056980736, %v990_v42  ;;  %v1106_v34 = vmul.bf16 1056980736, %v3228_v20 }
 0x16c   : > { %v1029_v18 = vmul.bf16 1056980736, %v989_v45  ;;  %v1145_v35 = vadd.bf16 1056980736, %v1105_v21 }
 0x16d   : > { %v1146_v44 = vadd.bf16 1056980736, %v1106_v34  ;;  %v3102_v34 = vld [vmem:[#allocation2 + $0x118] ss:$20 sps:$4 sm:$0xff]  }
 0x16e   : > { %v3708_v48 = vpop.f32.mrb[44].mxu0  ;;  %1714 = vmatmul.mubr.bf16.vlgmr.msra.gmra.mrb[0].mxu1 %v3079_v46 }
 0x16f   : > { %v3710_v50 = vpop.f32.mrb[45].mxu0  ;;  %1721 = vmatprep.mubr.bf16.mxu1 %v3082_v47 }
 0x170   : > { %v3712_v51 = vpop.f32.mrb[46].mxu0 }
 0x171   : > { %v992_v52 = vpack.c.bf16 %v3712_v51, %v3708_v48  ;;  %v3716_v53 = vpop.f32.mrb[47].mxu0 }
 0x172   : > { %v991_v54 = vpack.c.bf16 %v3716_v53, %v3710_v50 }
 0x173   : > { %v1032_v49 = vmul.bf16 1056980736, %v992_v52 }
 0x174   : > { %v1031_v38 = vmul.bf16 1056980736, %v991_v54 }
 0x176   : > { %v2908_v58 = vpop.f32.mrb[48].mxu0  ;;  %1722 = vmatmul.mubr.bf16.gmra.mrb[4].mxu1 %v3084_v55 }
 0x177   : > { %v842_v59 = vpop.f32.mrb[49].mxu0  ;;  %1729 = vmatprep.mubr.bf16.mxu1 %v3085_v56 }
 0x178   : > { %v2909_v61 = vpop.f32.mrb[50].mxu0 }
 0x179   : > { %v994_v63 = vpack.c.bf16 %v2909_v61, %v2908_v58  ;;  %v845_v2 = vpop.f32.mrb[51].mxu0  ;;  %v3096_v58 = vld [vmem:[#allocation2 + $0xc8] ss:$20 sps:$4 sm:$0xff]  }
 0x17a   : > { %v993_v3 = vpack.c.bf16 %v845_v2, %v842_v59 }
 0x17b   : > { %v1034_v5 = vmul.bf16 1056980736, %v994_v63 }
 0x17c   : > { %v1033_v8 = vmul.bf16 1056980736, %v993_v3 }
 0x17d   : > { %3229 = vtanh.bf16 %v1034_v5 }
 0x17e   : > { %3231 = vtanh.bf16 %v1033_v8  ;;  %v2912_v1 = vpop.f32.mrb[52].mxu0  ;;  %1730 = vmatmul.mubr.bf16.gmra.mrb[8].mxu1 %v3087_v4 }
 0x17f   : > { %v858_v10 = vpop.f32.mrb[53].mxu0  ;;  %1737 = vmatprep.mubr.bf16.mxu1 %v3088_v7  ;;  %3233 = vtanh.bf16 %v1027_v62 }
 0x180   : > { %v2913_v6 = vpop.f32.mrb[54].mxu0  ;;  %3235 = vtanh.bf16 %v1028_v11 }
 0x181   : > { %v996_v0 = vpack.c.bf16 %v2913_v6, %v2912_v1  ;;  %v861_v9 = vpop.f32.mrb[55].mxu0 }
 0x182   : > { %v995_v12 = vpack.c.bf16 %v861_v9, %v858_v10 }
 0x183   : > { %v1036_v14 = vmul.bf16 1056980736, %v996_v0 }
 0x184   : > { %v1035_v17 = vmul.bf16 1056980736, %v995_v12 }
 0x185   : > { %3237 = vtanh.bf16 %v1036_v14 }
 0x186   : > { %3239 = vtanh.bf16 %v1035_v17  ;;  %v2916_v19 = vpop.f32.mrb[56].mxu0  ;;  %1738 = vmatmul.mubr.bf16.gmra.mrb[12].mxu1 %v3090_v13  ;;  %v3099_v13 = vld [vmem:[#allocation2 + $0xf0] ss:$20 sps:$4 sm:$0xff]  }
 0x187   : > { %v874_v22 = vpop.f32.mrb[57].mxu0  ;;  %1745 = vmatprep.mubr.bf16.mxu1 %v3091_v15  ;;  %3241 = vtanh.bf16 %v1029_v18  ;;  %v3100_v15 = vld [vmem:[#allocation2 + $0x11c] ss:$20 sps:$4 sm:$0xff]  }
 0x188   : > { %v3230_v23 = vpop.eup %3229  ;;  %v2917_v25 = vpop.f32.mrb[58].mxu0  ;;  %3243 = vtanh.bf16 %v1030_v24 }
 0x189   : > { %v3232_v26 = vpop.eup %3231  ;;  %v998_v27 = vpack.c.bf16 %v2917_v25, %v2916_v19  ;;  %v877_v28 = vpop.f32.mrb[59].mxu0  ;;  %v1114_v29 = vmul.bf16 1056980736, %v3230_v23 }
 0x18a   : > { %v997_v30 = vpack.c.bf16 %v877_v28, %v874_v22  ;;  %v1113_v32 = vmul.bf16 1056980736, %v3232_v26  ;;  %v3234_v37 = vpop.eup %3233 }
 0x18b   : > { %v1038_v36 = vmul.bf16 1056980736, %v998_v27  ;;  %v1154_v43 = vadd.bf16 1056980736, %v1114_v29  ;;  %v3236_v42 = vpop.eup %3235  ;;  %v1107_v45 = vmul.bf16 1056980736, %v3234_v37 }
 0x18c   : > { %v1037_v39 = vmul.bf16 1056980736, %v997_v30  ;;  %v1153_v40 = vadd.bf16 1056980736, %v1113_v32  ;;  %v1108_v61 = vmul.bf16 1056980736, %v3236_v42 }
 0x18d   : > { %3245 = vtanh.bf16 %v1038_v36  ;;  %v1147_v63 = vadd.bf16 1056980736, %v1107_v45  ;;  %v3103_v36 = vld [vmem:[#allocation2 + $0x144] ss:$20 sps:$4 sm:$0xff]  }
 0x18e   : > { %3247 = vtanh.bf16 %v1037_v39  ;;  %v2920_v41 = vpop.f32.mrb[60].mxu0  ;;  %1746 = vmatmul.mubr.bf16.gmra.mrb[16].mxu1 %v3093_v31  ;;  %2698 = vmatprep.subr.bf16.mxu1 %v1153_v40  ;;  %v1148_v7 = vadd.bf16 1056980736, %v1108_v61 }
 0x18f   : > { %v890_v46 = vpop.f32.mrb[61].mxu0  ;;  %2699 = vmatpush3.bf16.msra.mxu1 %v1145_v35  ;;  %1753 = vmatprep.mubr.bf16.mxu1 %v3094_v33  ;;  %3249 = vtanh.bf16 %v1031_v38 }
 0x190   : > { %v3238_v47 = vpop.eup %3237  ;;  %v2921_v55 = vpop.f32.mrb[62].mxu0  ;;  %2700 = vmatprep.subr.bf16.mxu1 %v1154_v43  ;;  %3251 = vtanh.bf16 %v1032_v49 }
 0x191   : > { %v3240_v50 = vpop.eup %3239  ;;  %v1000_v53 = vpack.c.bf16 %v2921_v55, %v2920_v41  ;;  %v893_v54 = vpop.f32.mrb[63].mxu0  ;;  %v1116_v56 = vmul.bf16 1056980736, %v3238_v47 }
 0x192   : > { %v999_v57 = vpack.c.bf16 %v893_v54, %v890_v46  ;;  %v1115_v59 = vmul.bf16 1056980736, %v3240_v50  ;;  %v3242_v3 = vpop.eup %3241 }
 0x193   : > { %v1040_v2 = vmul.bf16 1056980736, %v1000_v53  ;;  %2701 = vmatpush3.bf16.msra.mxu1 %v1146_v44  ;;  %v1156_v51 = vadd.bf16 1056980736, %v1116_v56  ;;  %v3244_v5 = vpop.eup %3243  ;;  %v1109_v8 = vmul.bf16 1056980736, %v3242_v3 }
 0x194   : > { %v1039_v4 = vmul.bf16 1056980736, %v999_v57  ;;  %v1155_v48 = vadd.bf16 1056980736, %v1115_v59  ;;  %v1110_v16 = vmul.bf16 1056980736, %v3244_v5 }
 0x195   : > { %3253 = vtanh.bf16 %v1040_v2  ;;  %v1149_v17 = vadd.bf16 1056980736, %v1109_v8  ;;  %v3105_v56 = vld [vmem:[#allocation2 + $0x140] ss:$20 sps:$4 sm:$0xff]  }
 0x196   : > { %3255 = vtanh.bf16 %v1039_v4  ;;  %v2924_v52 = vpop.f32.mrb[64].mxu0  ;;  %1754 = vmatmul.mubr.bf16.gmra.mrb[20].mxu1 %v3096_v58  ;;  %2702 = vmatprep.subr.bf16.mxu1 %v1155_v48  ;;  %v1150_v25 = vadd.bf16 1056980736, %v1110_v16  ;;  %v3106_v59 = vld [vmem:[#allocation2 + $0x16c] ss:$20 sps:$4 sm:$0xff]  }
 0x197   : > { %v906_v62 = vpop.f32.mrb[65].mxu0  ;;  %2703 = vmatpush3.bf16.msra.mxu1 %v1147_v63  ;;  %1761 = vmatprep.mubr.bf16.mxu1 %v3097_v60  ;;  %v3111_v16 = vld [vmem:[#allocation2 + $0x190] ss:$20 sps:$4 sm:$0xff]  }
 0x198   : > { %v3246_v1 = vpop.eup %3245  ;;  %v2925_v10 = vpop.f32.mrb[66].mxu0  ;;  %2704 = vmatprep.subr.bf16.mxu1 %v1156_v51 }
 0x199   : > { %v3248_v11 = vpop.eup %3247  ;;  %v1002_v6 = vpack.c.bf16 %v2925_v10, %v2924_v52  ;;  %v909_v0 = vpop.f32.mrb[67].mxu0  ;;  %v1118_v9 = vmul.bf16 1056980736, %v3246_v1 }
 0x19a   : > { %v1001_v12 = vpack.c.bf16 %v909_v0, %v906_v62  ;;  %v1117_v14 = vmul.bf16 1056980736, %v3248_v11  ;;  %v3250_v19 = vpop.eup %3249  ;;  %v3108_v62 = vld [vmem:[#allocation2 + $0x168] ss:$20 sps:$4 sm:$0xff]  }
 0x19b   : > { %v1042_v18 = vmul.bf16 1056980736, %v1002_v6  ;;  %2705 = vmatpush3.bf16.msra.mxu1 %v1148_v7  ;;  %v1158_v22 = vadd.bf16 1056980736, %v1118_v9  ;;  %v3252_v24 = vpop.eup %3251  ;;  %v1111_v26 = vmul.bf16 1056980736, %v3250_v19 }
 0x19c   : > { %v1041_v20 = vmul.bf16 1056980736, %v1001_v12  ;;  %v1157_v21 = vadd.bf16 1056980736, %v1117_v14  ;;  %v1112_v39 = vmul.bf16 1056980736, %v3252_v24 }
 0x19d   : > { %3257 = vtanh.bf16 %v1042_v18  ;;  %v1151_v40 = vadd.bf16 1056980736, %v1111_v26  ;;  %v3109_v11 = vld [vmem:[#allocation2 + $0x194] ss:$20 sps:$4 sm:$0xff]   ;;  %v3112_v18 = vld [vmem:[#allocation2 + $0x1bc] ss:$20 sps:$4 sm:$0xff]  }
 0x19e   : > { %3259 = vtanh.bf16 %v1041_v20  ;;  %1762 = vmatmul.mubr.bf16.gmra.mrb[24].mxu1 %v3099_v13  ;;  %2706 = vmatprep.subr.bf16.mxu1 %v1157_v21  ;;  %v2928_v23 = vpop.f32.mrb[68].mxu0  ;;  %v1152_v45 = vadd.bf16 1056980736, %v1112_v39  ;;  %v3114_v24 = vld [vmem:[#allocation2 + $0x1b8] ss:$20 sps:$4 sm:$0xff]  }
 0x19f   : > { %2707 = vmatpush3.bf16.msra.mxu1 %v1149_v17  ;;  %1769 = vmatprep.mubr.bf16.mxu1 %v3100_v15  ;;  %v922_v27 = vpop.f32.mrb[69].mxu0  ;;  %v3115_v26 = vld [vmem:[#allocation2 + $0x1e4] ss:$20 sps:$4 sm:$0xff]  }
 0x1a0   : > { %v3254_v28 = vpop.eup %3253  ;;  %2708 = vmatprep.subr.bf16.mxu1 %v1158_v22  ;;  %v2929_v29 = vpop.f32.mrb[70].mxu0  ;;  %v3147_v39 = vld [vmem:[#allocation2 + $0xd8] ss:$20 sps:$4 sm:$0xff]  }
 0x1a1   : > { %v3256_v30 = vpop.eup %3255  ;;  %v1120_v31 = vmul.bf16 1056980736, %v3254_v28  ;;  %v1004_v32 = vpack.c.bf16 %v2929_v29, %v2928_v23  ;;  %v925_v33 = vpop.f32.mrb[71].mxu0  ;;  %v3117_v29 = vld [vmem:[#allocation2 + $0x1e0] ss:$20 sps:$4 sm:$0xff]  }
 0x1a2   : > { %v1119_v35 = vmul.bf16 1056980736, %v3256_v30  ;;  %v1003_v37 = vpack.c.bf16 %v925_v33, %v922_v27  ;;  %v3131_v30 = vld [vmem:[#allocation2 + $0x38] ss:$20 sps:$4 sm:$0xff]   ;;  %v3120_v33 = vld [vmem:[#allocation2 + $0x208] ss:$20 sps:$4 sm:$0xff]  }
 0x1a3   : > { %2709 = vmatpush3.bf16.msra.mxu1 %v1150_v25  ;;  %v1044_v43 = vmul.bf16 1056980736, %v1004_v32  ;;  %v1160_v41 = vadd.bf16 1056980736, %v1120_v31  ;;  %v3118_v31 = vld [vmem:[#allocation2 + $0x20c] ss:$20 sps:$4 sm:$0xff]  }
 0x1a4   : > { %v1159_v38 = vadd.bf16 1056980736, %v1119_v35  ;;  %v1043_v42 = vmul.bf16 1056980736, %v1003_v37  ;;  %v3138_v32 = vld [vmem:[#allocation2 + $0x60] ss:$20 sps:$4 sm:$0xff]  }
 0x1a5   : > { %3261 = vtanh.bf16 %v1044_v43  ;;  %v3121_v35 = vld [vmem:[#allocation2 + $0x234] ss:$20 sps:$4 sm:$0xff]   ;;  %v3123_v37 = vld [vmem:[#allocation2 + $0x230] ss:$20 sps:$4 sm:$0xff]  }
 0x1a6   : > { %1770 = vmatmul.mubr.bf16.gmra.mrb[28].mxu1 %v3102_v34  ;;  %2710 = vmatprep.subr.bf16.mxu1 %v1159_v38  ;;  %3263 = vtanh.bf16 %v1043_v42  ;;  %v2932_v44 = vpop.f32.mrb[72].mxu0  ;;  %v3139_v34 = vld [vmem:[#allocation2 + $0x88] ss:$20 sps:$4 sm:$0xff]   ;;  %v3154_v43 = vld [vmem:[#allocation2 + $0x100] ss:$20 sps:$4 sm:$0xff]  }
 0x1a7   : > { %2711 = vmatpush3.bf16.msra.mxu1 %v1151_v40  ;;  %1777 = vmatprep.mubr.bf16.mxu1 %v3103_v36  ;;  %v938_v46 = vpop.f32.mrb[73].mxu0  ;;  %v3146_v36 = vld [vmem:[#allocation2 + $0xb0] ss:$20 sps:$4 sm:$0xff]   ;;  %v3126_v38 = vld [vmem:[#allocation2 + $0x258] ss:$20 sps:$4 sm:$0xff]  }
 0x1a8   : > { %v3258_v47 = vpop.eup %3257  ;;  %2712 = vmatprep.subr.bf16.mxu1 %v1160_v41  ;;  %v2933_v49 = vpop.f32.mrb[74].mxu0  ;;  %v3124_v40 = vld [vmem:[#allocation2 + $0x25c] ss:$20 sps:$4 sm:$0xff]   ;;  %v3129_v42 = vld [vmem:[#allocation2 + $0xc] ss:$20 sps:$4 sm:$0xff]  }
 0x1a9   : > { %v3260_v55 = vpop.eup %3259  ;;  %v1122_v50 = vmul.bf16 1056980736, %v3258_v47  ;;  %v1006_v53 = vpack.c.bf16 %v2933_v49, %v2932_v44  ;;  %v941_v54 = vpop.f32.mrb[75].mxu0  ;;  %v3155_v41 = vld [vmem:[#allocation2 + $0x128] ss:$20 sps:$4 sm:$0xff]  }
 0x1aa   : > { %v1121_v57 = vmul.bf16 1056980736, %v3260_v55  ;;  %v1005_v58 = vpack.c.bf16 %v941_v54, %v938_v46  ;;  %v3162_v44 = vld [vmem:[#allocation2 + $0x150] ss:$20 sps:$4 sm:$0xff]   ;;  %v3163_v46 = vld [vmem:[#allocation2 + $0x178] ss:$20 sps:$4 sm:$0xff]  }
 0x1ab   : > { %2713 = vmatpush3.bf16.msra.mxu1 %v1152_v45  ;;  %v1046_v60 = vmul.bf16 1056980736, %v1006_v53  ;;  %v1162_v63 = vadd.bf16 1056980736, %v1122_v50  ;;  %v3127_v45 = vld [vmem:[#allocation2 + $0x8] ss:$20 sps:$4 sm:$0xff]  }
 0x1ac   : > { %v1161_v61 = vadd.bf16 1056980736, %v1121_v57  ;;  %v1045_v2 = vmul.bf16 1056980736, %v1005_v58  ;;  %v3132_v47 = vld [vmem:[#allocation2 + $0x34] ss:$20 sps:$4 sm:$0xff]  }
 0x1ad   : > { %3265 = vtanh.bf16 %v1046_v60  ;;  %v3170_v49 = vld [vmem:[#allocation2 + $0x1a0] ss:$20 sps:$4 sm:$0xff]   ;;  %v3134_v55 = vld [vmem:[#allocation2 + $0x30] ss:$20 sps:$4 sm:$0xff]   ;;  %v3171_v50 = vld [vmem:[#allocation2 + $0x1c8] ss:$20 sps:$4 sm:$0xff]  }
 0x1ae   : > { %1778 = vmatmul.mubr.bf16.gmra.mrb[32].mxu1 %v3105_v56  ;;  %2938 = vmatprep.subr.bf16.mxu0 %v1161_v61  ;;  %3267 = vtanh.bf16 %v1045_v2  ;;  %v2936_v3 = vpop.f32.mrb[76].mxu0  ;;  %v3135_v53 = vld [vmem:[#allocation2 + $0x5c] ss:$20 sps:$4 sm:$0xff]   ;;  %v3137_v56 = vld [vmem:[#allocation2 + $0x58] ss:$20 sps:$4 sm:$0xff]  }
 0x1af   : > { %2939 = vmatpush3.bf16.msra.mxu0 %v1161_v61  ;;  %1785 = vmatprep.mubr.bf16.mxu1 %v3106_v59  ;;  %v954_v4 = vpop.f32.mrb[77].mxu0  ;;  %v3178_v54 = vld [vmem:[#allocation2 + $0x1f0] ss:$20 sps:$4 sm:$0xff]   ;;  %v3179_v57 = vld [vmem:[#allocation2 + $0x218] ss:$20 sps:$4 sm:$0xff]  }
 0x1b0   : > { %v3262_v48 = vpop.eup %3261  ;;  %2940 = vmatprep.subr.bf16.mxu0 %v1162_v63  ;;  %v2937_v51 = vpop.f32.mrb[78].mxu0  ;;  %v3140_v58 = vld [vmem:[#allocation2 + $0x84] ss:$20 sps:$4 sm:$0xff]   ;;  %v3186_v59 = vld [vmem:[#allocation2 + $0x240] ss:$20 sps:$4 sm:$0xff]  }
 0x1b1   : > { %v3264_v52 = vpop.eup %3263  ;;  %v1124_v5 = vmul.bf16 1056980736, %v3262_v48  ;;  %v1008_v7 = vpack.c.bf16 %v2937_v51, %v2936_v3  ;;  %v957_v8 = vpop.f32.mrb[79].mxu0  ;;  %v3142_v60 = vld [vmem:[#allocation2 + $0x80] ss:$20 sps:$4 sm:$0xff]  }
 0x1b2   : > { %v1123_v1 = vmul.bf16 1056980736, %v3264_v52  ;;  %v1007_v10 = vpack.c.bf16 %v957_v8, %v954_v4  ;;  %v3187_v61 = vld [vmem:[#allocation2 + $0x268] ss:$20 sps:$4 sm:$0xff]   ;;  %v3150_v4 = vld [vmem:[#allocation2 + $0xd0] ss:$20 sps:$4 sm:$0xff]  }
 0x1b3   : > { %2941 = vmatpush3.bf16.msra.mxu0 %v1162_v63  ;;  %v1048_v6 = vmul.bf16 1056980736, %v1008_v7  ;;  %v1164_v9 = vadd.bf16 1056980736, %v1124_v5  ;;  %v3143_v63 = vld [vmem:[#allocation2 + $0xac] ss:$20 sps:$4 sm:$0xff]  }
 0x1b4   : > { %v1163_v0 = vadd.bf16 1056980736, %v1123_v1  ;;  %v1047_v12 = vmul.bf16 1056980736, %v1007_v10  ;;  %v3145_v2 = vld [vmem:[#allocation2 + $0xa8] ss:$20 sps:$4 sm:$0xff]  }
 0x1b5   : > { %3269 = vtanh.bf16 %v1048_v6  ;;  %v3148_v3 = vld [vmem:[#allocation2 + $0xd4] ss:$20 sps:$4 sm:$0xff]   ;;  %v3151_v48 = vld [vmem:[#allocation2 + $0xfc] ss:$20 sps:$4 sm:$0xff]   ;;  %v3153_v51 = vld [vmem:[#allocation2 + $0xf8] ss:$20 sps:$4 sm:$0xff]  }
 0x1b6   : > { %1786 = vmatmul.mubr.bf16.gmra.mrb[36].mxu1 %v3108_v62  ;;  %2942 = vmatprep.subr.bf16.mxu0 %v1163_v0  ;;  %3271 = vtanh.bf16 %v1047_v12  ;;  %v3156_v52 = vld [vmem:[#allocation2 + $0x124] ss:$20 sps:$4 sm:$0xff]   ;;  %v3158_v5 = vld [vmem:[#allocation2 + $0x120] ss:$20 sps:$4 sm:$0xff]   ;;  %v3161_v8 = vld [vmem:[#allocation2 + $0x148] ss:$20 sps:$4 sm:$0xff]  }
 0x1b7   : > { %1793 = vmatprep.mubr.bf16.mxu1 %v3109_v11  ;;  %2943 = vmatpush3.bf16.msra.mxu0 %v1163_v0  ;;  %v3159_v7 = vld [vmem:[#allocation2 + $0x14c] ss:$20 sps:$4 sm:$0xff]   ;;  %v3164_v62 = vld [vmem:[#allocation2 + $0x174] ss:$20 sps:$4 sm:$0xff]   ;;  %v3166_v1 = vld [vmem:[#allocation2 + $0x170] ss:$20 sps:$4 sm:$0xff]  }
 0x1b8   : > { %v3266_v13 = vpop.eup %3265  ;;  %2944 = vmatprep.subr.bf16.mxu0 %v1164_v9  ;;  %v3167_v10 = vld [vmem:[#allocation2 + $0x19c] ss:$20 sps:$4 sm:$0xff]   ;;  %v3169_v11 = vld [vmem:[#allocation2 + $0x198] ss:$20 sps:$4 sm:$0xff]  }
 0x1b9   : > { %v3268_v14 = vpop.eup %3267  ;;  %v1126_v15 = vmul.bf16 1056980736, %v3266_v13  ;;  %v3172_v6 = vld [vmem:[#allocation2 + $0x1c4] ss:$20 sps:$4 sm:$0xff]   ;;  %v3175_v13 = vld [vmem:[#allocation2 + $0x1ec] ss:$20 sps:$4 sm:$0xff]  }
 0x1ba   : > { %v1125_v17 = vmul.bf16 1056980736, %v3268_v14 }
 0x1bb   : > { %2945 = vmatpush3.bf16.msra.mxu0 %v1164_v9  ;;  %v1166_v20 = vadd.bf16 1056980736, %v1126_v15  ;;  %v3174_v9 = vld [vmem:[#allocation2 + $0x1c0] ss:$20 sps:$4 sm:$0xff]  }
 0x1bc   : > { %v1165_v19 = vadd.bf16 1056980736, %v1125_v17 }
 0x1be   : > { %1794 = vmatmul.mubr.bf16.gmra.mrb[40].mxu1 %v3111_v16  ;;  %2946 = vmatprep.subr.bf16.mxu0 %v1165_v19 }
 0x1bf   : > { %1801 = vmatprep.mubr.bf16.mxu1 %v3112_v18  ;;  %2947 = vmatpush3.bf16.msra.mxu0 %v1165_v19  ;;  %v3177_v19 = vld [vmem:[#allocation2 + $0x1e8] ss:$20 sps:$4 sm:$0xff]  }
 0x1c0   : > { %v3270_v21 = vpop.eup %3269  ;;  %2948 = vmatprep.subr.bf16.mxu0 %v1166_v20 }
 0x1c1   : > { %v3272_v22 = vpop.eup %3271  ;;  %v1128_v23 = vmul.bf16 1056980736, %v3270_v21  ;;  %v3180_v21 = vld [vmem:[#allocation2 + $0x214] ss:$20 sps:$4 sm:$0xff]  }
 0x1c2   : > { %v1127_v25 = vmul.bf16 1056980736, %v3272_v22 }
 0x1c3   : > { %2949 = vmatpush3.bf16.msra.mxu0 %v1166_v20  ;;  %v1168_v28 = vadd.bf16 1056980736, %v1128_v23 }
 0x1c4   : > { %v1167_v27 = vadd.bf16 1056980736, %v1127_v25 }
 0x1c6   : > { %1802 = vmatmul.mubr.bf16.gmra.mrb[44].mxu1 %v3114_v24  ;;  %2950 = vmatprep.subr.bf16.mxu0 %v1167_v27 }
 0x1c7   : > { %1809 = vmatprep.mubr.bf16.mxu1 %v3115_v26  ;;  %2951 = vmatpush3.bf16.msra.mxu0 %v1167_v27  ;;  %v3182_v27 = vld [vmem:[#allocation2 + $0x210] ss:$20 sps:$4 sm:$0xff]  }
 0x1c8   : > { %2952 = vmatprep.subr.bf16.mxu0 %v1168_v28 }
 0x1cb   : > { %2953 = vmatpush3.bf16.msra.mxu0 %v1168_v28 }
 0x1ce   : > { %1810 = vmatmul.mubr.bf16.gmra.mrb[48].mxu1 %v3117_v29  ;;  %2955 = vmatmul.mubr.bf16.vlgmr.msra.gmra.mrb[80].mxu0 %v3131_v30  ;;  %v3183_v29 = vld [vmem:[#allocation2 + $0x23c] ss:$20 sps:$4 sm:$0xff]  }
 0x1cf   : > { %1817 = vmatprep.mubr.bf16.mxu1 %v3118_v31  ;;  %2958 = vmatprep.mubr.bf16.mxu0 %v3138_v32 }
 0x1d6   : > { %1818 = vmatmul.mubr.bf16.gmra.mrb[52].mxu1 %v3120_v33  ;;  %2959 = vmatmul.mubr.bf16.gmra.mrb[84].mxu0 %v3139_v34 }
 0x1d7   : > { %1825 = vmatprep.mubr.bf16.mxu1 %v3121_v35  ;;  %2962 = vmatprep.mubr.bf16.mxu0 %v3146_v36  ;;  %v3185_v35 = vld [vmem:[#allocation2 + $0x238] ss:$20 sps:$4 sm:$0xff]  }
 0x1de   : > { %1826 = vmatmul.mubr.bf16.gmra.mrb[56].mxu1 %v3123_v37  ;;  %2963 = vmatmul.mubr.bf16.gmra.mrb[88].mxu0 %v3147_v39  ;;  %v3188_v37 = vld [vmem:[#allocation2 + $0x264] ss:$20 sps:$4 sm:$0xff]  }
 0x1df   : > { %1833 = vmatprep.mubr.bf16.mxu1 %v3124_v40  ;;  %2966 = vmatprep.mubr.bf16.mxu0 %v3154_v43 }
 0x1e6   : > { %1834 = vmatmul.mubr.bf16.gmra.mrb[60].mxu1 %v3126_v38  ;;  %2967 = vmatmul.mubr.bf16.gmra.mrb[92].mxu0 %v3155_v41 }
 0x1e7   : > { %1874 = vmatprep.mubr.bf16.mxu1 %v3129_v42  ;;  %2970 = vmatprep.mubr.bf16.mxu0 %v3162_v44  ;;  %v3190_v42 = vld [vmem:[#allocation2 + $0x260] ss:$20 sps:$4 sm:$0xff]  }
 0x1ee   : > { %1875 = vmatmul.mubr.bf16.vlgmr.msra.gmra.mrb[64].mxu1 %v3127_v45  ;;  %2971 = vmatmul.mubr.bf16.gmra.mrb[96].mxu0 %v3163_v46 }
 0x1ef   : > { %1882 = vmatprep.mubr.bf16.mxu1 %v3132_v47  ;;  %2974 = vmatprep.mubr.bf16.mxu0 %v3170_v49 }
 0x1f6   : > { %1883 = vmatmul.mubr.bf16.gmra.mrb[68].mxu1 %v3134_v55  ;;  %2975 = vmatmul.mubr.bf16.gmra.mrb[100].mxu0 %v3171_v50 }
 0x1f7   : > { %1890 = vmatprep.mubr.bf16.mxu1 %v3135_v53  ;;  %2978 = vmatprep.mubr.bf16.mxu0 %v3178_v54 }
 0x1fe   : > { %1891 = vmatmul.mubr.bf16.gmra.mrb[72].mxu1 %v3137_v56  ;;  %2979 = vmatmul.mubr.bf16.gmra.mrb[104].mxu0 %v3179_v57 }
 0x1ff   : > { %1898 = vmatprep.mubr.bf16.mxu1 %v3140_v58  ;;  %2982 = vmatprep.mubr.bf16.mxu0 %v3186_v59 }
 0x206   : > { %1899 = vmatmul.mubr.bf16.gmra.mrb[76].mxu1 %v3142_v60  ;;  %2983 = vmatmul.mubr.bf16.gmra.mrb[108].mxu0 %v3187_v61 }
 0x207   : > { %1906 = vmatprep.mubr.bf16.mxu1 %v3143_v63 }
 0x20e   : > { %1907 = vmatmul.mubr.bf16.gmra.mrb[80].mxu1 %v3145_v2 }
 0x20f   : > { %1914 = vmatprep.mubr.bf16.mxu1 %v3148_v3 }
 0x216   : > { %1915 = vmatmul.mubr.bf16.gmra.mrb[84].mxu1 %v3150_v4 }
 0x217   : > { %1922 = vmatprep.mubr.bf16.mxu1 %v3151_v48 }
 0x21e   : > { %1923 = vmatmul.mubr.bf16.gmra.mrb[88].mxu1 %v3153_v51 }
 0x21f   : > { %1930 = vmatprep.mubr.bf16.mxu1 %v3156_v52 }
 0x226   : > { %1931 = vmatmul.mubr.bf16.gmra.mrb[92].mxu1 %v3158_v5 }
 0x227   : > { %1938 = vmatprep.mubr.bf16.mxu1 %v3159_v7 }
 0x22e   : > { %1939 = vmatmul.mubr.bf16.gmra.mrb[96].mxu1 %v3161_v8 }
 0x22f   : > { %1946 = vmatprep.mubr.bf16.mxu1 %v3164_v62 }
 0x236   : > { %1947 = vmatmul.mubr.bf16.gmra.mrb[100].mxu1 %v3166_v1 }
 0x237   : > { %1954 = vmatprep.mubr.bf16.mxu1 %v3167_v10 }
 0x23e   : > { %1955 = vmatmul.mubr.bf16.gmra.mrb[104].mxu1 %v3169_v11 }
 0x23f   : > { %1962 = vmatprep.mubr.bf16.mxu1 %v3172_v6 }
 0x241   : > { %v2602_v0 = vpop.f32.mrb[0].mxu1 }
 0x242   : > { %v2603_v12 = vpop.f32.mrb[1].mxu1 }
 0x243   : > { %v3732_v14 = vadd.f32 %v2603_v12, %v2602_v0  ;;  %v2605_v15 = vpop.f32.mrb[2].mxu1 }
 0x244   : > { %v2606_v16 = vpop.f32.mrb[3].mxu1 }
 0x245   : > { %v3734_v17 = vadd.f32 %v2606_v16, %v2605_v15 }
 0x246   : > { %1963 = vmatmul.mubr.bf16.gmra.mrb[108].mxu1 %v3174_v9 }
 0x247   : > { %1970 = vmatprep.mubr.bf16.mxu1 %v3175_v13 }
 0x249   : > { %v2608_v18 = vpop.f32.mrb[4].mxu1 }
 0x24a   : > { %v2609_v20 = vpop.f32.mrb[5].mxu1 }
 0x24b   : > { %v3736_v22 = vadd.f32 %v2609_v20, %v2608_v18  ;;  %v2611_v23 = vpop.f32.mrb[6].mxu1 }
 0x24c   : > { %v2612_v24 = vpop.f32.mrb[7].mxu1 }
 0x24d   : > { %v3738_v25 = vadd.f32 %v2612_v24, %v2611_v23 }
 0x24e   : > { %1971 = vmatmul.mubr.bf16.gmra.mrb[112].mxu1 %v3177_v19 }
 0x24f   : > { %1978 = vmatprep.mubr.bf16.mxu1 %v3180_v21 }
 0x251   : > { %v2614_v26 = vpop.f32.mrb[8].mxu1 }
 0x252   : > { %v2615_v28 = vpop.f32.mrb[9].mxu1 }
 0x253   : > { %v3740_v30 = vadd.f32 %v2615_v28, %v2614_v26  ;;  %v2617_v31 = vpop.f32.mrb[10].mxu1 }
 0x254   : > { %v2618_v32 = vpop.f32.mrb[11].mxu1 }
 0x255   : > { %v3742_v33 = vadd.f32 %v2618_v32, %v2617_v31 }
 0x256   : > { %1979 = vmatmul.mubr.bf16.gmra.mrb[116].mxu1 %v3182_v27 }
 0x257   : > { %1986 = vmatprep.mubr.bf16.mxu1 %v3183_v29 }
 0x259   : > { %v2620_v34 = vpop.f32.mrb[12].mxu1 }
 0x25a   : > { %v2621_v36 = vpop.f32.mrb[13].mxu1 }
 0x25b   : > { %v3744_v39 = vadd.f32 %v2621_v36, %v2620_v34  ;;  %v2623_v40 = vpop.f32.mrb[14].mxu1 }
 0x25c   : > { %v2624_v43 = vpop.f32.mrb[15].mxu1 }
 0x25d   : > { %v3746_v38 = vadd.f32 %v2624_v43, %v2623_v40 }
 0x25e   : > { %1987 = vmatmul.mubr.bf16.gmra.mrb[120].mxu1 %v3185_v35 }
 0x25f   : > { %1994 = vmatprep.mubr.bf16.mxu1 %v3188_v37 }
 0x261   : > { %v2626_v41 = vpop.f32.mrb[16].mxu1 }
 0x262   : > { %v2627_v44 = vpop.f32.mrb[17].mxu1 }
 0x263   : > { %v3748_v45 = vadd.f32 %v2627_v44, %v2626_v41  ;;  %v2629_v46 = vpop.f32.mrb[18].mxu1 }
 0x264   : > { %v2630_v47 = vpop.f32.mrb[19].mxu1 }
 0x265   : > { %v3750_v49 = vadd.f32 %v2630_v47, %v2629_v46 }
 0x266   : > { %1995 = vmatmul.mubr.bf16.gmra.mrb[124].mxu1 %v3190_v42 }
 0x269   : > { %v2632_v55 = vpop.f32.mrb[20].mxu1 }
 0x26a   : > { %v2633_v50 = vpop.f32.mrb[21].mxu1 }
 0x26b   : > { %v3752_v53 = vadd.f32 %v2633_v50, %v2632_v55  ;;  %v2635_v54 = vpop.f32.mrb[22].mxu1 }
 0x26c   : > { %v2636_v56 = vpop.f32.mrb[23].mxu1 }
 0x26d   : > { %v3754_v57 = vadd.f32 %v2636_v56, %v2635_v54 }
 0x271   : > { %v2638_v58 = vpop.f32.mrb[24].mxu1 }
 0x272   : > { %v2639_v59 = vpop.f32.mrb[25].mxu1 }
 0x273   : > { %v3756_v60 = vadd.f32 %v2639_v59, %v2638_v58  ;;  %v2641_v61 = vpop.f32.mrb[26].mxu1 }
 0x274   : > { %v2642_v63 = vpop.f32.mrb[27].mxu1 }
 0x275   : > { %v3758_v2 = vadd.f32 %v2642_v63, %v2641_v61 }
 0x279   : > { %v2644_v3 = vpop.f32.mrb[28].mxu1 }
 0x27a   : > { %v2645_v4 = vpop.f32.mrb[29].mxu1 }
 0x27b   : > { %v3760_v48 = vadd.f32 %v2645_v4, %v2644_v3  ;;  %v2647_v51 = vpop.f32.mrb[30].mxu1 }
 0x27c   : > { %v2648_v52 = vpop.f32.mrb[31].mxu1 }
 0x27d   : > { %v3762_v5 = vadd.f32 %v2648_v52, %v2647_v51 }
 0x281   : > { %v2650_v7 = vpop.f32.mrb[32].mxu1 }
 0x282   : > { %v2651_v8 = vpop.f32.mrb[33].mxu1 }
 0x283   : > { %v3764_v62 = vadd.f32 %v2651_v8, %v2650_v7  ;;  %v2653_v1 = vpop.f32.mrb[34].mxu1 }
 0x284   : > { %v2654_v10 = vpop.f32.mrb[35].mxu1 }
 0x285   : > { %v3766_v11 = vadd.f32 %v2654_v10, %v2653_v1 }
 0x289   : > { %v2656_v6 = vpop.f32.mrb[36].mxu1 }
 0x28a   : > { %v2657_v0 = vpop.f32.mrb[37].mxu1 }
 0x28b   : > { %v3768_v9 = vadd.f32 %v2657_v0, %v2656_v6  ;;  %v2659_v12 = vpop.f32.mrb[38].mxu1 }
 0x28c   : > { %v2660_v13 = vpop.f32.mrb[39].mxu1 }
 0x28d   : > { %v3770_v15 = vadd.f32 %v2660_v13, %v2659_v12 }
 0x291   : > { %v2662_v16 = vpop.f32.mrb[40].mxu1 }
 0x292   : > { %v2663_v18 = vpop.f32.mrb[41].mxu1 }
 0x293   : > { %v3772_v19 = vadd.f32 %v2663_v18, %v2662_v16  ;;  %v2665_v20 = vpop.f32.mrb[42].mxu1 }
 0x294   : > { %v2666_v21 = vpop.f32.mrb[43].mxu1 }
 0x295   : > { %v3774_v23 = vadd.f32 %v2666_v21, %v2665_v20 }
 0x299   : > { %v2668_v24 = vpop.f32.mrb[44].mxu1 }
 0x29a   : > { %v2669_v26 = vpop.f32.mrb[45].mxu1 }
 0x29b   : > { %v3776_v27 = vadd.f32 %v2669_v26, %v2668_v24  ;;  %v2671_v28 = vpop.f32.mrb[46].mxu1 }
 0x29c   : > { %v2672_v29 = vpop.f32.mrb[47].mxu1 }
 0x29d   : > { %v3778_v31 = vadd.f32 %v2672_v29, %v2671_v28 }
 0x2a1   : > { %v2674_v32 = vpop.f32.mrb[48].mxu1  ;;  %v3780_v34 = vpop.f32.mrb[80].mxu0 }
 0x2a2   : > { %v2675_v35 = vpop.f32.mrb[49].mxu1  ;;  %v2037_v36 = vpop.f32.mrb[81].mxu0 }
 0x2a3   : > { %v3782_v37 = vadd.f32 %v2675_v35, %v2674_v32  ;;  %v2677_v40 = vpop.f32.mrb[50].mxu1  ;;  %v2957_v43 = vpop.f32.mrb[82].mxu0 }
 0x2a4   : > { %v2678_v41 = vpop.f32.mrb[51].mxu1  ;;  %v2040_v42 = vpop.f32.mrb[83].mxu0 }
 0x2a5   : > { %v3784_v44 = vadd.f32 %v2678_v41, %v2677_v40 }
 0x2a9   : > { %v2680_v46 = vpop.f32.mrb[52].mxu1  ;;  %v3786_v47 = vpop.f32.mrb[84].mxu0 }
 0x2aa   : > { %v2681_v55 = vpop.f32.mrb[53].mxu1  ;;  %v3788_v50 = vpop.f32.mrb[85].mxu0 }
 0x2ab   : > { %v3790_v54 = vadd.f32 %v2681_v55, %v2680_v46  ;;  %v2683_v56 = vpop.f32.mrb[54].mxu1  ;;  %v3792_v58 = vpop.f32.mrb[86].mxu0 }
 0x2ac   : > { %v2684_v59 = vpop.f32.mrb[55].mxu1  ;;  %v3794_v61 = vpop.f32.mrb[87].mxu0 }
 0x2ad   : > { %v3796_v63 = vadd.f32 %v2684_v59, %v2683_v56 }
 0x2af   : > { %4059 = vst [vmem:[#allocation8_spill] sm:$0xff] %v3796_v63 }
 0x2b1   : > { %v2686_v3 = vpop.f32.mrb[56].mxu1  ;;  %v3798_v4 = vpop.f32.mrb[88].mxu0 }
 0x2b2   : > { %v2687_v51 = vpop.f32.mrb[57].mxu1  ;;  %v3800_v52 = vpop.f32.mrb[89].mxu0 }
 0x2b3   : > { %v3802_v7 = vadd.f32 %v2687_v51, %v2686_v3  ;;  %v2689_v8 = vpop.f32.mrb[58].mxu1  ;;  %v3804_v1 = vpop.f32.mrb[90].mxu0 }
 0x2b4   : > { %v2690_v10 = vpop.f32.mrb[59].mxu1  ;;  %v3806_v6 = vpop.f32.mrb[91].mxu0 }
 0x2b5   : > { %4060 = vst [vmem:[#allocation9_spill] sm:$0xff] %v3802_v7  ;;  %v3808_v0 = vadd.f32 %v2690_v10, %v2689_v8 }
 0x2b7   : > { %4061 = vst [vmem:[#allocation10_spill] sm:$0xff] %v3808_v0 }
 0x2b9   : > { %v2692_v12 = vpop.f32.mrb[60].mxu1  ;;  %v3810_v13 = vpop.f32.mrb[92].mxu0 }
 0x2ba   : > { %v2693_v16 = vpop.f32.mrb[61].mxu1  ;;  %v3812_v18 = vpop.f32.mrb[93].mxu0 }
 0x2bb   : > { %v3814_v20 = vadd.f32 %v2693_v16, %v2692_v12  ;;  %v2695_v21 = vpop.f32.mrb[62].mxu1  ;;  %v3816_v24 = vpop.f32.mrb[94].mxu0 }
 0x2bc   : > { %v2696_v26 = vpop.f32.mrb[63].mxu1  ;;  %v3818_v28 = vpop.f32.mrb[95].mxu0 }
 0x2bd   : > { %4062 = vst [vmem:[#allocation11_spill] sm:$0xff] %v3814_v20  ;;  %v3820_v29 = vadd.f32 %v2696_v26, %v2695_v21 }
 0x2bf   : > { %4063 = vst [vmem:[#allocation12_spill] sm:$0xff] %v3820_v29 }
 0x2c1   : > { %v2714_v32 = vpop.f32.mrb[64].mxu1  ;;  %v3822_v35 = vpop.f32.mrb[96].mxu0 }
 0x2c2   : > { %v2715_v40 = vpop.f32.mrb[65].mxu1  ;;  %v3824_v41 = vpop.f32.mrb[97].mxu0 }
 0x2c3   : > { %v2716_v46 = vadd.f32 %v2715_v40, %v2714_v32  ;;  %v2717_v55 = vpop.f32.mrb[66].mxu1  ;;  %v3826_v56 = vpop.f32.mrb[98].mxu0 }
 0x2c4   : > { %v2718_v59 = vpop.f32.mrb[67].mxu1  ;;  %v3828_v3 = vpop.f32.mrb[99].mxu0 }
 0x2c5   : > { %v2719_v51 = vadd.f32 %v2718_v59, %v2717_v55  ;;  %v1877_v8 = vadd.f32 %v2716_v46, %v3732_v14 }
 0x2c7   : > { %v3831_v10 = vadd.f32 %v2037_v36, %v1877_v8  ;;  %v1880_v12 = vadd.f32 %v2719_v51, %v3734_v17 }
 0x2c9   : > { %v3834_v16 = vadd.f32 %v2040_v42, %v1880_v12  ;;  %v2720_v21 = vpop.f32.mrb[68].mxu1  ;;  %v3836_v26 = vpop.f32.mrb[100].mxu0 }
 0x2ca   : > { %v2721_v29 = vpop.f32.mrb[69].mxu1  ;;  %v3838_v32 = vpop.f32.mrb[101].mxu0 }
 0x2cb   : > { %v2722_v20 = vadd.f32 %v2721_v29, %v2720_v21  ;;  %v2723_v0 = vpop.f32.mrb[70].mxu1  ;;  %v3842_v55 = vpop.f32.mrb[102].mxu0 }
 0x2cc   : > { %v2724_v14 = vpop.f32.mrb[71].mxu1  ;;  %v3844_v36 = vpop.f32.mrb[103].mxu0 }
 0x2cd   : > { %v1885_v17 = vadd.f32 %v2722_v20, %v3736_v22  ;;  %v2725_v42 = vadd.f32 %v2724_v14, %v2723_v0 }
 0x2cf   : > { %v3848_v46 = vadd.f32 %v3780_v34, %v1885_v17  ;;  %v1888_v59 = vadd.f32 %v2725_v42, %v3738_v25  ;;  %v3871_v17 = vld [vmem:[%s4046_s3] sm:$0xff] }
 0x2d0   : > { %4064 = vst [vmem:[#allocation13_spill] sm:$0xff] %v3871_v17  ;;  %v2541_v42 = vcombine.high %v3871_v17, %v3871_v17 }
 0x2d1   : > { %v3851_v51 = vadd.f32 %v2957_v43, %v1888_v59  ;;  %v2726_v8 = vpop.f32.mrb[72].mxu1  ;;  %v3853_v12 = vpop.f32.mrb[104].mxu0 }
 0x2d2   : > { %v2727_v29 = vpop.f32.mrb[73].mxu1  ;;  %v3855_v21 = vpop.f32.mrb[105].mxu0  ;;  %2284 = vmatprep.mubr.bf16.mxu0 %v2541_v42 }
 0x2d3   : > { %v2728_v7 = vadd.f32 %v2727_v29, %v2726_v8  ;;  %v2729_v63 = vpop.f32.mrb[74].mxu1  ;;  %v3859_v22 = vpop.f32.mrb[106].mxu0 }
 0x2d4   : > { %v2730_v0 = vpop.f32.mrb[75].mxu1  ;;  %v3861_v34 = vpop.f32.mrb[107].mxu0 }
 0x2d5   : > { %v2731_v20 = vadd.f32 %v2730_v0, %v2729_v63  ;;  %v1893_v25 = vadd.f32 %v2728_v7, %v3740_v30 }
 0x2d7   : > { %v3865_v43 = vadd.f32 %v3788_v50, %v1893_v25  ;;  %v1896_v14 = vadd.f32 %v2731_v20, %v3742_v33 }
 0x2d9   : > { %v3876_v59 = vadd.f32 %v3794_v61, %v1896_v14  ;;  %v2732_v8 = vpop.f32.mrb[76].mxu1  ;;  %v3878_v63 = vpop.f32.mrb[108].mxu0 }
 0x2da   : > { %4065 = vst [vmem:[#allocation14_spill] sm:$0xff] %v3878_v63  ;;  %v2733_v30 = vpop.f32.mrb[77].mxu1  ;;  %v3880_v7 = vpop.f32.mrb[109].mxu0 }
 0x2db   : > { %4066 = vst [vmem:[#allocation15_spill] sm:$0xff] %v3880_v7  ;;  %v2734_v50 = vadd.f32 %v2733_v30, %v2732_v8  ;;  %v2735_v29 = vpop.f32.mrb[78].mxu1  ;;  %v3884_v0 = vpop.f32.mrb[110].mxu0 }
 0x2dc   : > { %4067 = vst [vmem:[#allocation16_spill] sm:$0xff] %v3884_v0  ;;  %v2736_v20 = vpop.f32.mrb[79].mxu1  ;;  %v3886_v25 = vpop.f32.mrb[111].mxu0 }
 0x2dd   : > { %4068 = vst [vmem:[#allocation17_spill] sm:$0xff] %v3886_v25  ;;  %v1901_v61 = vadd.f32 %v2734_v50, %v3744_v39  ;;  %v2737_v14 = vadd.f32 %v2736_v20, %v2735_v29 }
 0x2df   : > { %v3890_v40 = vadd.f32 %v3786_v47, %v1901_v61  ;;  %v1904_v17 = vadd.f32 %v2737_v14, %v3746_v38 }
 0x2e1   : > { %v3894_v42 = vadd.f32 %v3792_v58, %v1904_v17  ;;  %v2738_v63 = vpop.f32.mrb[80].mxu1 }
 0x2e2   : > { %v2739_v33 = vpop.f32.mrb[81].mxu1 }
 0x2e3   : > { %v2167_v8 = vpack.c.bf16 %v3894_v42, %v3890_v40  ;;  %v2740_v30 = vadd.f32 %v2739_v33, %v2738_v63  ;;  %v2741_v0 = vpop.f32.mrb[82].mxu1 }
 0x2e4   : > { %v2742_v7 = vpop.f32.mrb[83].mxu1 }
 0x2e5   : > { %v2743_v25 = vadd.f32 %v2742_v7, %v2741_v0  ;;  %v1909_v39 = vadd.f32 %v2740_v30, %v3748_v45 }
 0x2e7   : > { %v3900_v50 = vadd.f32 %v3800_v52, %v1909_v39  ;;  %v1912_v47 = vadd.f32 %v2743_v25, %v3750_v49 }
 0x2e9   : > { %v3904_v38 = vadd.f32 %v3806_v6, %v1912_v47  ;;  %v2744_v58 = vpop.f32.mrb[84].mxu1 }
 0x2ea   : > { %v2745_v17 = vpop.f32.mrb[85].mxu1 }
 0x2eb   : > { %v2168_v29 = vpack.c.bf16 %v3904_v38, %v3900_v50  ;;  %v2746_v20 = vadd.f32 %v2745_v17, %v2744_v58  ;;  %v2747_v63 = vpop.f32.mrb[86].mxu1 }
 0x2ec   : > { %v2748_v33 = vpop.f32.mrb[87].mxu1 }
 0x2ed   : > { %v1917_v7 = vadd.f32 %v2746_v20, %v3752_v53  ;;  %v2749_v0 = vadd.f32 %v2748_v33, %v2747_v63 }
 0x2ef   : > { %v3910_v45 = vadd.f32 %v3798_v4, %v1917_v7  ;;  %v1920_v52 = vadd.f32 %v2749_v0, %v3754_v57 }
 0x2f1   : > { %v3914_v49 = vadd.f32 %v3804_v1, %v1920_v52  ;;  %v2750_v6 = vpop.f32.mrb[88].mxu1 }
 0x2f2   : > { %v2751_v25 = vpop.f32.mrb[89].mxu1 }
 0x2f3   : > { %v2169_v61 = vpack.c.bf16 %v3914_v49, %v3910_v45  ;;  %v2752_v14 = vadd.f32 %v2751_v25, %v2750_v6  ;;  %v2753_v30 = vpop.f32.mrb[90].mxu1 }
 0x2f4   : > { %v2754_v39 = vpop.f32.mrb[91].mxu1 }
 0x2f5   : > { %v2755_v47 = vadd.f32 %v2754_v39, %v2753_v30  ;;  %v1925_v53 = vadd.f32 %v2752_v14, %v3756_v60 }
 0x2f7   : > { %v3920_v58 = vadd.f32 %v3812_v18, %v1925_v53  ;;  %v1928_v4 = vadd.f32 %v2755_v47, %v3758_v2 }
 0x2f9   : > { %v3924_v57 = vadd.f32 %v3818_v28, %v1928_v4  ;;  %v2756_v1 = vpop.f32.mrb[92].mxu1 }
 0x2fa   : > { %v2757_v17 = vpop.f32.mrb[93].mxu1 }
 0x2fb   : > { %v2170_v20 = vpack.c.bf16 %v3924_v57, %v3920_v58  ;;  %v2758_v63 = vadd.f32 %v2757_v17, %v2756_v1  ;;  %v2759_v33 = vpop.f32.mrb[94].mxu1 }
 0x2fc   : > { %v2760_v7 = vpop.f32.mrb[95].mxu1 }
 0x2fd   : > { %v1933_v0 = vadd.f32 %v2758_v63, %v3760_v48  ;;  %v2761_v52 = vadd.f32 %v2760_v7, %v2759_v33 }
 0x2ff   : > { %v3930_v60 = vadd.f32 %v3810_v13, %v1933_v0  ;;  %v1936_v18 = vadd.f32 %v2761_v52, %v3762_v5  ;;  %v4069_v5 = vpack.c.bf16 %v3834_v16, %v3831_v10  ;;  %v4070_v10 = vpack.c.bf16 %v3851_v51, %v3848_v46 }
 0x301   : > { %v3934_v2 = vadd.f32 %v3816_v24, %v1936_v18  ;;  %v2762_v28 = vpop.f32.mrb[96].mxu1  ;;  %v2180_v24 = vmul.bf16 1056980736, %v4069_v5 }
 0x302   : > { %v2763_v6 = vpop.f32.mrb[97].mxu1 }
 0x303   : > { %v2171_v25 = vpack.c.bf16 %v3934_v2, %v3930_v60  ;;  %v2764_v14 = vadd.f32 %v2763_v6, %v2762_v28  ;;  %v2765_v30 = vpop.f32.mrb[98].mxu1  ;;  %3273 = vtanh.bf16 %v2180_v24 }
 0x304   : > { %v2766_v39 = vpop.f32.mrb[99].mxu1 }
 0x305   : > { %v2767_v47 = vadd.f32 %v2766_v39, %v2765_v30  ;;  %v1941_v48 = vadd.f32 %v2764_v14, %v3764_v62 }
 0x307   : > { %v2102_v53 = vadd.f32 %v3824_v41, %v1941_v48  ;;  %v1944_v13 = vadd.f32 %v2767_v47, %v3766_v11 }
 0x309   : > { %v2105_v4 = vadd.f32 %v3828_v3, %v1944_v13  ;;  %v2768_v1 = vpop.f32.mrb[100].mxu1  ;;  %v2181_v3 = vmul.bf16 1056980736, %v4070_v10 }
 0x30a   : > { %v2769_v17 = vpop.f32.mrb[101].mxu1 }
 0x30b   : > { %v2172_v63 = vpack.c.bf16 %v2105_v4, %v2102_v53  ;;  %v2770_v33 = vadd.f32 %v2769_v17, %v2768_v1  ;;  %v2771_v7 = vpop.f32.mrb[102].mxu1 }
 0x30c   : > { %v2772_v0 = vpop.f32.mrb[103].mxu1 }
 0x30d   : > { %v2188_v52 = vmul.bf16 1056980736, %v2172_v63  ;;  %v1949_v62 = vadd.f32 %v2770_v33, %v3768_v9  ;;  %v2773_v18 = vadd.f32 %v2772_v0, %v2771_v7 }
 0x30f   : > { %3275 = vtanh.bf16 %v2188_v52  ;;  %v2110_v11 = vadd.f32 %v3822_v35, %v1949_v62  ;;  %v1952_v41 = vadd.f32 %v2773_v18, %v3770_v15  ;;  %v3274_v35 = vpop.eup %3273  ;;  %v2183_v18 = vmul.bf16 1056980736, %v2167_v8 }
 0x310   : > { %3277 = vtanh.bf16 %v2181_v3  ;;  %v2212_v4 = vmul.bf16 1056980736, %v3274_v35 }
 0x311   : > { %v2113_v16 = vadd.f32 %v3826_v56, %v1952_v41  ;;  %v2774_v28 = vpop.f32.mrb[104].mxu1  ;;  %v4071_v56 = vpack.c.bf16 %v3876_v59, %v3865_v43 }
 0x312   : > { %v2775_v6 = vpop.f32.mrb[105].mxu1  ;;  %v2228_v62 = vadd.bf16 1056980736, %v2212_v4 }
 0x313   : > { %v2173_v14 = vpack.c.bf16 %v2113_v16, %v2110_v11  ;;  %v2776_v30 = vadd.f32 %v2775_v6, %v2774_v28  ;;  %v2777_v39 = vpop.f32.mrb[106].mxu1  ;;  %v2182_v46 = vmul.bf16 1056980736, %v4071_v56 }
 0x314   : > { %v2778_v47 = vpop.f32.mrb[107].mxu1 }
 0x315   : > { %v2189_v9 = vmul.bf16 1056980736, %v2173_v14  ;;  %v2779_v48 = vadd.f32 %v2778_v47, %v2777_v39  ;;  %v1957_v53 = vadd.f32 %v2776_v30, %v3772_v19 }
 0x317   : > { %v2118_v15 = vadd.f32 %v3838_v32, %v1957_v53  ;;  %v1960_v13 = vadd.f32 %v2779_v48, %v3774_v23  ;;  %3279 = vtanh.bf16 %v2189_v9  ;;  %v2184_v9 = vmul.bf16 1056980736, %v2168_v29  ;;  %v4072_v29 = vld [vmem:[#allocation8_spill] sm:$0xff] }
 0x318   : > { %3281 = vtanh.bf16 %v2182_v46 }
 0x319   : > { %v2121_v51 = vadd.f32 %v3844_v36, %v1960_v13  ;;  %v2780_v5 = vpop.f32.mrb[108].mxu1 }
 0x31a   : > { %v3276_v24 = vpop.eup %3275  ;;  %v2781_v1 = vpop.f32.mrb[109].mxu1 }
 0x31b   : > { %v2174_v17 = vpack.c.bf16 %v2121_v51, %v2118_v15  ;;  %v2782_v63 = vadd.f32 %v2781_v1, %v2780_v5  ;;  %v2783_v33 = vpop.f32.mrb[110].mxu1  ;;  %v2220_v19 = vmul.bf16 1056980736, %v3276_v24  ;;  %v3278_v43 = vpop.eup %3277 }
 0x31c   : > { %v2784_v7 = vpop.f32.mrb[111].mxu1  ;;  %v2213_v3 = vmul.bf16 1056980736, %v3278_v43 }
 0x31d   : > { %v2190_v32 = vmul.bf16 1056980736, %v2174_v17  ;;  %v1965_v23 = vadd.f32 %v2782_v63, %v3776_v27  ;;  %v2785_v0 = vadd.f32 %v2784_v7, %v2783_v33  ;;  %v2236_v52 = vadd.bf16 1056980736, %v2220_v19 }
 0x31e   : > { %v2229_v40 = vadd.bf16 1056980736, %v2213_v3  ;;  %v2185_v17 = vmul.bf16 1056980736, %v2169_v61  ;;  %v4074_v61 = vld [vmem:[#allocation15_spill] sm:$0xff] }
 0x31f   : > { %3283 = vtanh.bf16 %v2190_v32  ;;  %v2126_v36 = vadd.f32 %v3836_v26, %v1965_v23  ;;  %v1968_v59 = vadd.f32 %v2785_v0, %v3778_v31  ;;  %2834 = vmatprep.subr.bf16.mxu0 %v2236_v52 }
 0x320   : > { %2835 = vmatpush3.bf16.msra.mxu0 %v2228_v62  ;;  %3285 = vtanh.bf16 %v2183_v18 }
 0x321   : > { %v2129_v11 = vadd.f32 %v3842_v55, %v1968_v59  ;;  %v2786_v41 = vpop.f32.mrb[112].mxu1 }
 0x322   : > { %v3280_v10 = vpop.eup %3279  ;;  %v2787_v27 = vpop.f32.mrb[113].mxu1 }
 0x323   : > { %v2175_v16 = vpack.c.bf16 %v2129_v11, %v2126_v36  ;;  %v2788_v28 = vadd.f32 %v2787_v27, %v2786_v41  ;;  %v2789_v6 = vpop.f32.mrb[114].mxu1  ;;  %v2221_v14 = vmul.bf16 1056980736, %v3280_v10  ;;  %v3282_v42 = vpop.eup %3281  ;;  %v4073_v36 = vld [vmem:[#allocation9_spill] sm:$0xff]  ;;  %v2186_v10 = vmul.bf16 1056980736, %v2170_v20 }
 0x324   : > { %v2790_v26 = vpop.f32.mrb[115].mxu1  ;;  %v2214_v15 = vmul.bf16 1056980736, %v3282_v42  ;;  %v4076_v27 = vld [vmem:[#allocation17_spill] sm:$0xff]  ;;  %v4077_v42 = vld [vmem:[#allocation11_spill] sm:$0xff]  ;;  %v4078_v20 = vld [vmem:[#allocation14_spill] sm:$0xff] }
 0x325   : > { %v2191_v30 = vmul.bf16 1056980736, %v2175_v16  ;;  %v2791_v31 = vadd.f32 %v2790_v26, %v2789_v6  ;;  %v1973_v39 = vadd.f32 %v2788_v28, %v3782_v37  ;;  %v2237_v47 = vadd.bf16 1056980736, %v2221_v14 }
 0x326   : > { %v2230_v50 = vadd.bf16 1056980736, %v2214_v15  ;;  %v2187_v15 = vmul.bf16 1056980736, %v2171_v25 }
 0x327   : > { %v2134_v8 = vadd.f32 %v3855_v21, %v1973_v39  ;;  %2836 = vmatprep.subr.bf16.mxu0 %v2237_v47  ;;  %v1976_v55 = vadd.f32 %v2791_v31, %v3784_v44  ;;  %3287 = vtanh.bf16 %v2191_v30 }
 0x328   : > { %2837 = vmatpush3.bf16.msra.mxu0 %v2229_v40  ;;  %3289 = vtanh.bf16 %v2184_v9 }
 0x329   : > { %v2137_v48 = vadd.f32 %v3861_v34, %v1976_v55  ;;  %v2792_v53 = vpop.f32.mrb[116].mxu1 }
 0x32a   : > { %v3284_v35 = vpop.eup %3283  ;;  %v2793_v37 = vpop.f32.mrb[117].mxu1 }
 0x32b   : > { %v2176_v13 = vpack.c.bf16 %v2137_v48, %v2134_v8  ;;  %v2794_v56 = vadd.f32 %v2793_v37, %v2792_v53  ;;  %v2795_v46 = vpop.f32.mrb[118].mxu1  ;;  %v2222_v51 = vmul.bf16 1056980736, %v3284_v35  ;;  %v3286_v38 = vpop.eup %3285  ;;  %v4079_v53 = vld [vmem:[#allocation12_spill] sm:$0xff] }
 0x32c   : > { %v2796_v21 = vpop.f32.mrb[119].mxu1  ;;  %v2215_v7 = vmul.bf16 1056980736, %v3286_v38  ;;  %v4080_v37 = vld [vmem:[#allocation16_spill] sm:$0xff] }
 0x32d   : > { %v2192_v5 = vmul.bf16 1056980736, %v2176_v13  ;;  %v1981_v44 = vadd.f32 %v2794_v56, %v3790_v54  ;;  %v2797_v24 = vadd.f32 %v2796_v21, %v2795_v46  ;;  %v2238_v4 = vadd.bf16 1056980736, %v2222_v51 }
 0x32e   : > { %v2231_v45 = vadd.bf16 1056980736, %v2215_v7 }
 0x32f   : > { %3291 = vtanh.bf16 %v2192_v5  ;;  %v2142_v34 = vadd.f32 %v3853_v12, %v1981_v44  ;;  %v1984_v1 = vadd.f32 %v2797_v24, %v4072_v29  ;;  %2838 = vmatprep.subr.bf16.mxu0 %v2238_v4 }
 0x330   : > { %2839 = vmatpush3.bf16.msra.mxu0 %v2230_v50  ;;  %3293 = vtanh.bf16 %v2185_v17 }
 0x331   : > { %v2145_v63 = vadd.f32 %v3859_v22, %v1984_v1  ;;  %v2798_v33 = vpop.f32.mrb[120].mxu1  ;;  %v4075_v22 = vld [vmem:[#allocation10_spill] sm:$0xff] }
 0x332   : > { %v3288_v19 = vpop.eup %3287  ;;  %v2799_v54 = vpop.f32.mrb[121].mxu1 }
 0x333   : > { %v2177_v32 = vpack.c.bf16 %v2145_v63, %v2142_v34  ;;  %v2800_v23 = vadd.f32 %v2799_v54, %v2798_v33  ;;  %v2801_v0 = vpop.f32.mrb[122].mxu1  ;;  %v2223_v52 = vmul.bf16 1056980736, %v3288_v19  ;;  %v3290_v49 = vpop.eup %3289  ;;  %v4081_v19 = vld [vmem:[#allocation13_spill] sm:$0xff] }
 0x334   : > { %v2802_v12 = vpop.f32.mrb[123].mxu1  ;;  %v2216_v6 = vmul.bf16 1056980736, %v3290_v49  ;;  %v2540_v54 = vcombine.low %v4081_v19, %v4081_v19 }
 0x335   : > { %v2193_v62 = vmul.bf16 1056980736, %v2177_v32  ;;  %v2803_v43 = vadd.f32 %v2802_v12, %v2801_v0  ;;  %v1989_v59 = vadd.f32 %v2800_v23, %v4073_v36  ;;  %v2239_v18 = vadd.bf16 1056980736, %v2223_v52 }
 0x336   : > { %v2232_v58 = vadd.bf16 1056980736, %v2216_v6 }
 0x337   : > { %v2150_v11 = vadd.f32 %v4074_v61, %v1989_v59  ;;  %2840 = vmatprep.subr.bf16.mxu0 %v2239_v18  ;;  %v1992_v41 = vadd.f32 %v2803_v43, %v4075_v22  ;;  %3295 = vtanh.bf16 %v2193_v62 }
 0x338   : > { %2841 = vmatpush3.bf16.msra.mxu0 %v2231_v45  ;;  %3297 = vtanh.bf16 %v2186_v10 }
 0x339   : > { %v2153_v3 = vadd.f32 %v4076_v27, %v1992_v41  ;;  %v2804_v16 = vpop.f32.mrb[124].mxu1 }
 0x33a   : > { %v3292_v28 = vpop.eup %3291  ;;  %v2805_v14 = vpop.f32.mrb[125].mxu1 }
 0x33b   : > { %v2178_v26 = vpack.c.bf16 %v2153_v3, %v2150_v11  ;;  %v2806_v30 = vadd.f32 %v2805_v14, %v2804_v16  ;;  %v2807_v31 = vpop.f32.mrb[126].mxu1  ;;  %v2224_v39 = vmul.bf16 1056980736, %v3292_v28  ;;  %v3294_v57 = vpop.eup %3293 }
 0x33c   : > { %v2808_v47 = vpop.f32.mrb[127].mxu1  ;;  %v2217_v46 = vmul.bf16 1056980736, %v3294_v57 }
 0x33d   : > { %v2194_v40 = vmul.bf16 1056980736, %v2178_v26  ;;  %v1997_v8 = vadd.f32 %v2806_v30, %v4077_v42  ;;  %v2809_v55 = vadd.f32 %v2808_v47, %v2807_v31  ;;  %v2240_v9 = vadd.bf16 1056980736, %v2224_v39 }
 0x33e   : > { %v2233_v24 = vadd.bf16 1056980736, %v2217_v46 }
 0x33f   : > { %3299 = vtanh.bf16 %v2194_v40  ;;  %v2158_v48 = vadd.f32 %v4078_v20, %v1997_v8  ;;  %v2000_v35 = vadd.f32 %v2809_v55, %v4079_v53  ;;  %2842 = vmatprep.subr.bf16.mxu0 %v2240_v9 }
 0x340   : > { %2843 = vmatpush3.bf16.msra.mxu0 %v2232_v58  ;;  %3301 = vtanh.bf16 %v2187_v15 }
 0x341   : > { %v2161_v13 = vadd.f32 %v4080_v37, %v2000_v35 }
 0x342   : > { %v3296_v56 = vpop.eup %3295 }
 0x343   : > { %v2179_v51 = vpack.c.bf16 %v2161_v13, %v2158_v48  ;;  %v2225_v21 = vmul.bf16 1056980736, %v3296_v56  ;;  %v3298_v4 = vpop.eup %3297 }
 0x344   : > { %v2218_v38 = vmul.bf16 1056980736, %v3298_v4 }
 0x345   : > { %v2195_v5 = vmul.bf16 1056980736, %v2179_v51  ;;  %v2241_v44 = vadd.bf16 1056980736, %v2225_v21 }
 0x346   : > { %v2234_v25 = vadd.bf16 1056980736, %v2218_v38 }
 0x347   : > { %2844 = vmatprep.subr.bf16.mxu0 %v2241_v44  ;;  %3303 = vtanh.bf16 %v2195_v5 }
 0x348   : > { %2845 = vmatpush3.bf16.msra.mxu0 %v2233_v24 }
 0x34a   : > { %v3300_v50 = vpop.eup %3299 }
 0x34b   : > { %v2226_v60 = vmul.bf16 1056980736, %v3300_v50  ;;  %v3302_v34 = vpop.eup %3301 }
 0x34c   : > { %v2219_v1 = vmul.bf16 1056980736, %v3302_v34 }
 0x34d   : > { %v2242_v2 = vadd.bf16 1056980736, %v2226_v60 }
 0x34e   : > { %v2235_v33 = vadd.bf16 1056980736, %v2219_v1 }
 0x34f   : > { %2846 = vmatprep.subr.bf16.mxu0 %v2242_v2 }
 0x350   : > { %2847 = vmatpush3.bf16.msra.mxu0 %v2234_v25 }
 0x352   : > { %v3304_v29 = vpop.eup %3303 }
 0x353   : > { %v2227_v17 = vmul.bf16 1056980736, %v3304_v29 }
 0x355   : > { %v2243_v63 = vadd.bf16 1056980736, %v2227_v17 }
 0x357   : > { %2848 = vmatprep.subr.bf16.mxu0 %v2243_v63 }
 0x358   : > { %2849 = vmatpush3.bf16.msra.mxu0 %v2235_v33 }
 0x35b   : > { %2285 = vmatmul.mubr.bf16.vlgmr.msra.gmra.mrb[112].mxu0 %v2540_v54 }
 0x42e   : > { %v2850_v7 = vpop.f32.mrb[112].mxu0 }
 0x42f   : > { %v2851_v32 = vpop.f32.mrb[113].mxu0 }
 0x430   : > { %v2852_v23 = vadd.f32 %v2851_v32, %v2850_v7  ;;  %v2853_v0 = vpop.f32.mrb[114].mxu0 }
 0x431   : > { %v2854_v52 = vpop.f32.mrb[115].mxu0 }
 0x432   : > { %2292 = vst [vmem:[%s202_s6] sm:$0x1] %v2852_v23 }
 0x433   : > { %3346 = shalt.err (!%p3343_p7)
}
 0x434   : > { %s3347_s13 = scalar_lea.hbm %s4001_s8, 16  ;;  %s3351_s22 = scalar_lea.hbm %s4047_s4, 32 }
 0x435   : > { %p3348_p8 = scmp.ne.s32.totalorder %s4001_s8, %s3347_s13  ;;  %p3352_p1 = scmp.lt.u32.totalorder %s4001_s8, %s4047_s4 }
 0x436   : > { %p3353_p0 = scmp.lt.u32.totalorder %s3351_s22, %s3347_s13  ;;  %p3355_p6 = scmp.lt.u32.totalorder %s3347_s13, %s4001_s8 }
 0x437   : > { %p3349_p11 = pnand %p3348_p8, %p4082_p9 }
 0x438   : > { %p3354_p5 = por %p3353_p0, %p3352_p1 }
 0x439   : > { %p3350_p13 = pneg %p3349_p11 }
 0x43a   : > { %p3356_p10 = por %p3355_p6, %p3354_p5 }
 0x43c   : > { %p3357_p12 = pnand %p3356_p10, %p3350_p13 }
 0x43e   : > { %3360 = shalt.err (!%p3357_p12)
}
 0x43f   : > { %2991 = dma.vmem_to_hbm [thread:$0]  (%p4082_p9), %s4003_s27, 16, %s4001_s8, %s2294_s9  }
 0x440 PF: > { %p3003_p2 = scmp.ge.s32.totalorder %s3399_s18, 2  ;;  %s2318_s5 = sand.u32 1, %s3387_s15  }
 0x441   : > { %p4083_p3 = scmp.ne.s32.totalorder %s4053_s26, 0  ;;  %s2319_s30 = scalar_lea.sflag [#allocation4], %s2318_s5 }
 0x443   : > { %p2998_p4 = pnand %p3003_p2, %p4083_p3 }
 0x445   : > { %3382 = dma.done.wait (!%p2998_p4), %s2319_s30, 16  }
 0x446   : > { %3384 = vsyncadd (!%p2998_p4), %s2319_s30, 4294967280  ;;  %p15_p7 = scmp.ge.s32.totalorder %s3455_s21, 4   ;;  %s4084_s15 = smov %s3391_s16 }
 0x447   : > { %s4085_s16 = smov %s3395_s17  ;;  %s4086_s17 = smov %s3466_s24 }
 0x448   : > { %s4087_s18 = smov %s3455_s21  ;;  %17 = sbr.rel (!%p15_p7) target bundleno = 4 (0x4), region = 76 }
 0x44f   :  { %2323 = vsyncpa [#allocation3], 1 }
 0x450   :  { %2325 = vsyncpa [#allocation3 + $0x1], 1 }
 0x451   :  { %2326 = vsyncpa [#allocation4], 1 }
 0x452   :  { %2328 = vsyncpa [#allocation4 + $0x1], 1 }

</bundles_post_ra>
